<compile_context>
chip_gen: v7x
topology: tpu7x:2x2x1
jax: 0.10.0
libtpu: 0.0.40
codegen_flags: <defaults>
</compile_context>

<pallas_src>
import functools

import numpy as np
import jax
import jax.numpy as jnp
from jax import lax
from jax.experimental import pallas as pl
from jax.experimental.pallas import tpu as pltpu

EPS = 1e-5        # PyTorch BatchNorm2d default eps
LANE = 128        # TPU lane width


# --------------------------- small helpers ---------------------------

def _round_up(x, m):
    return ((x + m - 1) // m) * m


@functools.lru_cache(maxsize=None)
def _vmem_ceiling():
    """Per-generation scoped-VMEM ceiling: ~3/4 of physical VMEM
    (v5e/v6e: 128 MiB -> 96 MiB; v7x: 64 MiB -> 48 MiB)."""
    try:
        cap = int(pltpu.get_tpu_info().vmem_capacity_bytes)
    except Exception:
        cap = 64 << 20
    return (cap * 3) // 4


def _vmem_limit(*block_bytes):
    """Explicit scoped-VMEM budget: 2x (double buffering) + headroom, per-chip ceiling."""
    total = 2 * sum(block_bytes) + (8 << 20)
    return int(min(max(total, 16 << 20), _vmem_ceiling()))


def _choose_matmul_tm(m):
    """MXU row tile: 128-aligned minimum (v5e MXU), 256-aligned when M allows (v6e/v7x)."""
    m128 = _round_up(m, 128)
    if m128 <= 256:
        return m128
    if m128 < 1024:
        return 256
    return 512


def _choose_epilogue_tm(m_pad, tm_mat, c_pad, n_bf16_row_streams, out_bytes):
    """Epilogue (HBM-streaming) row tile: as large as the VMEM budget allows, but a
    multiple of the matmul tile so it divides m_pad exactly."""
    per_row = (2 * n_bf16_row_streams + out_bytes) * c_pad
    row_cap = max(tm_mat, (_vmem_ceiling() // 4) // max(per_row, 1))
    row_cap = min(row_cap, 2048)
    nt = m_pad // tm_mat
    for d in range(nt, 0, -1):
        if nt % d == 0 and tm_mat * d <= row_cap:
            return tm_mat * d
    return tm_mat


# --------------------------- Pallas kernels ---------------------------

def _conv_stats_kernel(p_ref, w_ref, o_ref, sum_ref, sq_ref):
    # (TM, K)bf16 @ (K, C)bf16 -> f32 on the MXU; store the tile in bf16 (halves the
    # conv->epilogue HBM round trip) and emit per-TILE partial sum / sum-of-squares taken
    # from the f32 accumulator (so stats precision is unaffected by the bf16 store).
    acc = jnp.dot(p_ref[...], w_ref[...], preferred_element_type=jnp.float32)
    o_ref[...] = acc.astype(o_ref.dtype)
    sum_ref[...] = jnp.sum(acc, axis=0, keepdims=True)
    sq_ref[...] = jnp.sum(acc * acc, axis=0, keepdims=True)


def _bn_relu_kernel(x_ref, scale_ref, bias_ref, o_ref):
    x = x_ref[...].astype(jnp.float32)
    o_ref[...] = jnp.maximum(x * scale_ref[...] + bias_ref[...], 0.0).astype(o_ref.dtype)


def _bn_res_relu_kernel(x_ref, scale_ref, bias_ref, r_ref, rs_ref, rb_ref, o_ref):
    # bn2 epilogue fused with the shortcut's BN apply, the residual add, and the final ReLU.
    y = x_ref[...].astype(jnp.float32) * scale_ref[...] + bias_ref[...]
    y = y + r_ref[...].astype(jnp.float32) * rs_ref[...] + rb_ref[...]
    o_ref[...] = jnp.maximum(y, 0.0).astype(o_ref.dtype)


# --------------------------- Pallas wrappers ---------------------------

def conv_bn_stats(patches_bf16, w_bf16, gamma_pad, beta_pad, *, tm, m_pad, m_true):
    """Fused conv-as-matmul (bf16 output) + per-tile BN batch statistics.

    Returns (conv_bf16 (m_pad, c_pad), scale (1, c_pad) f32, bias (1, c_pad) f32)."""
    m, k = patches_bf16.shape
    c_pad = w_bf16.shape[1]
    p = jnp.pad(patches_bf16, ((0, m_pad - m), (0, 0)))
    nt = m_pad // tm

    vmem = _vmem_limit(tm * k * 2, k * c_pad * 2, tm * c_pad * 2, 2 * c_pad * 4)
    conv, s_part, sq_part = pl.pallas_call(
        _conv_stats_kernel,
        out_shape=(jax.ShapeDtypeStruct((m_pad, c_pad), jnp.bfloat16),
                   jax.ShapeDtypeStruct((nt, 1, c_pad), jnp.float32),
                   jax.ShapeDtypeStruct((nt, 1, c_pad), jnp.float32)),
        grid=(nt,),
        in_specs=[pl.BlockSpec((tm, k), lambda i: (i, 0)),
                  # TODO(synk): pipeline_mode=pl.Buffered(1) on this constant-index weight
                  # block would free its second buffer (helps v7x's 64 MiB VMEM headroom).
                  pl.BlockSpec((k, c_pad), lambda i: (0, 0))],
        out_specs=(pl.BlockSpec((tm, c_pad), lambda i: (i, 0)),
                   pl.BlockSpec((None, 1, c_pad), lambda i: (i, 0, 0)),
                   pl.BlockSpec((None, 1, c_pad), lambda i: (i, 0, 0))),
        compiler_params=pltpu.CompilerParams(
            # Per-tile partial stats -> no in-place accumulator -> megacore-safe "parallel".
            dimension_semantics=("parallel",),
            vmem_limit_bytes=vmem),
    )(p, w_bf16)

    # Reduce the tiny per-tile partials in JAX.  Training-mode (biased) batch statistics;
    # the divisor is the TRUE row count (padded rows are zero and contribute nothing).
    s = jnp.sum(s_part, axis=0)
    sq = jnp.sum(sq_part, axis=0)
    mean = s / m_true
    # TODO(synk): one-pass E[x^2]-E[x]^2 can lose accuracy when |mean| >> std; a Welford-style
    # per-tile combine would be more robust if tighter-than-1e-2 accuracy is ever required.
    var = jnp.maximum(sq / m_true - mean * mean, 0.0)
    scale = gamma_pad * lax.rsqrt(var + EPS)
    bias = beta_pad - mean * scale
    return conv, scale, bias


def bn_epilogue(x, scale, bias, *, tm, residual=None, res_scale=None, res_bias=None,
                out_dtype=jnp.bfloat16):
    """BN normalize (+ optional shortcut-BN + residual add) + ReLU, tiled over rows.
    x / residual are bf16; scale/bias stay f32."""
    m_pad, c_pad = x.shape
    row_spec = pl.BlockSpec((tm, c_pad), lambda i: (i, 0))
    vec_spec = pl.BlockSpec((1, c_pad), lambda i: (0, 0))
    out_bytes = np.dtype(out_dtype).itemsize

    if residual is None:
        kernel = _bn_relu_kernel
        in_specs = [row_spec, vec_spec, vec_spec]
        args = (x, scale, bias)
        vmem = _vmem_limit(tm * c_pad * 2, tm * c_pad * out_bytes, 2 * c_pad * 4)
    else:
        kernel = _bn_res_relu_kernel
        in_specs = [row_spec, vec_spec, vec_spec, row_spec, vec_spec, vec_spec]
        args = (x, scale, bias, residual, res_scale, res_bias)
        vmem = _vmem_limit(2 * tm * c_pad * 2, tm * c_pad * out_bytes, 4 * c_pad * 4)

    return pl.pallas_call(
        kernel,
        out_shape=jax.ShapeDtypeStruct((m_pad, c_pad), out_dtype),
        grid=(m_pad // tm,),
        in_specs=in_specs,
        out_specs=row_spec,
        compiler_params=pltpu.CompilerParams(
            dimension_semantics=("parallel",), vmem_limit_bytes=vmem),
    )(*args)


# --------------------------- JAX glue (im2col etc.) ---------------------------

def im2col_3x3(x_nhwc, stride):
    n, h, w, c = x_nhwc.shape
    ho = (h + 2 - 3) // stride + 1
    wo = (w + 2 - 3) // stride + 1
    xp = jnp.pad(x_nhwc, ((0, 0), (1, 1), (1, 1), (0, 0)))
    cols = []
    for kh in range(3):
        for kw in range(3):
            cols.append(xp[:, kh:kh + stride * (ho - 1) + 1:stride,
                           kw:kw + stride * (wo - 1) + 1:stride, :])
    patches = jnp.stack(cols, axis=3)                       # (N, Ho, Wo, 9, C)
    return patches.reshape(n * ho * wo, 9 * c), (n, ho, wo)


def basic_block_nhwc(x_nhwc, params, *, planes, stride, out_dtype=jnp.bfloat16):
    """One ResNet BasicBlock on NHWC activations.  Output is NHWC, bf16 by default so the
    next block's bf16 conv consumes it directly (no NCHW<->NHWC transposes, no f32 re-read)."""
    x = x_nhwc.astype(jnp.bfloat16)          # bf16 BEFORE im2col: the 9x patches are bf16
    n, h, w, cin = x.shape
    c_pad = params["w1"].shape[1]

    # conv1 (3x3, stride): fused matmul + BN stats, then BN + ReLU epilogue (bf16 output:
    # it only feeds conv2's bf16 matmul).
    p1, (n, ho, wo) = im2col_3x3(x, stride)
    m = n * ho * wo
    tm = _choose_matmul_tm(m)
    m_pad = _round_up(m, tm)

    conv1, s1, b1 = conv_bn_stats(p1, params["w1"], params["g1"], params["b1"],
                                  tm=tm, m_pad=m_pad, m_true=m)
    tm_e1 = _choose_epilogue_tm(m_pad, tm, c_pad, n_bf16_row_streams=1, out_bytes=2)
    out1 = bn_epilogue(conv1, s1, b1, tm=tm_e1, out_dtype=jnp.bfloat16)
    out1_nhwc = out1[:m, :planes].reshape(n, ho, wo, planes)

    # shortcut branch: raw 1x1-conv matmul + stats; its BN-apply is folded into the final
    # epilogue (identity shortcut uses scale=1 / bias=0 and the bf16 input as residual).
    if "ws" in params:
        xs = x[:, ::stride, ::stride, :].reshape(m, cin)            # 1x1-conv im2col
        sc, ss, sb = conv_bn_stats(xs, params["ws"], params["gs"], params["bs"],
                                   tm=tm, m_pad=m_pad, m_true=m)
    else:
        # TODO(synk): read the identity residual at its native cin width in the epilogue
        # instead of lane-padding it to c_pad.
        sc = jnp.pad(x.reshape(m, cin), ((0, m_pad - m), (0, c_pad - cin)))
        ss = jnp.ones((1, c_pad), jnp.float32)
        sb = jnp.zeros((1, c_pad), jnp.float32)

    # conv2 (3x3, stride 1): fused matmul + BN stats, then bn2 + shortcut-BN + add + ReLU.
    # TODO(synk): fused halo-DMA conv would remove this second 9x im2col materialization.
    p2, _ = im2col_3x3(out1_nhwc, 1)
    conv2, s2, b2 = conv_bn_stats(p2, params["w2"], params["g2"], params["b2"],
                                  tm=tm, m_pad=m_pad, m_true=m)
    out_bytes = np.dtype(out_dtype).itemsize
    tm_e2 = _choose_epilogue_tm(m_pad, tm, c_pad, n_bf16_row_streams=2, out_bytes=out_bytes)
    out = bn_epilogue(conv2, s2, b2, tm=tm_e2, residual=sc, res_scale=ss, res_bias=sb,
                      out_dtype=out_dtype)
    return out[:m, :planes].reshape(n, ho, wo, planes)


def basic_block_forward(x_nchw, params, *, planes, stride):
    """NCHW / f32 adapter (PyTorch layout) around the NHWC-native block, for the demo check."""
    x = jnp.transpose(x_nchw, (0, 2, 3, 1))                  # NCHW -> NHWC
    out = basic_block_nhwc(x, params, planes=planes, stride=stride, out_dtype=jnp.float32)
    return jnp.transpose(out, (0, 3, 1, 2))                  # back to NCHW


# --------------------------- parameters ---------------------------

def init_params(key, in_planes, planes, stride):
    ks = jax.random.split(key, 3)
    raw = {
        # conv weights stored directly in im2col layout (K = 3*3*Cin, Cout)
        "w1": jax.random.normal(ks[0], (9 * in_planes, planes), jnp.float32) * 0.1,
        "g1": jnp.ones((planes,), jnp.float32),
        "b1": jnp.zeros((planes,), jnp.float32),
        "w2": jax.random.normal(ks[1], (9 * planes, planes), jnp.float32) * 0.1,
        "g2": jnp.ones((planes,), jnp.float32),
        "b2": jnp.zeros((planes,), jnp.float32),
    }
    if stride != 1 or in_planes != planes:
        raw["ws"] = jax.random.normal(ks[2], (in_planes, planes), jnp.float32) * 0.1
        raw["gs"] = jnp.ones((planes,), jnp.float32)
        raw["bs"] = jnp.zeros((planes,), jnp.float32)
    return raw


def prepare_params(raw):
    """One-time (outside the per-forward path) pad-to-c_pad + bf16 cast of the weights,
    and lane-padded f32 gamma/beta vectors (padded channels get gamma=0 -> exact zeros)."""
    planes = raw["w1"].shape[1]
    c_pad = _round_up(planes, LANE)

    def pad_w(w):
        return jnp.pad(w, ((0, 0), (0, c_pad - w.shape[1]))).astype(jnp.bfloat16)

    def pad_v(v):
        return jnp.pad(v, (0, c_pad - v.shape[0]))[None, :].astype(jnp.float32)

    prepped = {}
    for tag in ("1", "2"):
        prepped["w" + tag] = pad_w(raw["w" + tag])
        prepped["g" + tag] = pad_v(raw["g" + tag])
        prepped["b" + tag] = pad_v(raw["b" + tag])
    if "ws" in raw:
        prepped["ws"] = pad_w(raw["ws"])
        prepped["gs"] = pad_v(raw["gs"])
        prepped["bs"] = pad_v(raw["bs"])
    return prepped


# ------------------- pure-JAX reference (mirrors the kernel's mixed precision) -------------------

def ref_forward(x_nchw, raw, stride):
    """bf16 conv operands with f32 accumulation; BN stats from the f32 conv output; the
    normalize is applied to the bf16-stored conv output; intermediate activations bf16."""
    cin = x_nchw.shape[1]
    cout = raw["w1"].shape[1]
    xb = x_nchw.astype(jnp.bfloat16)

    def conv3x3(x, w_kc, ci, co, s):
        w = w_kc.reshape(3, 3, ci, co).transpose(3, 2, 0, 1)  # -> OIHW
        return lax.conv_general_dilated(
            x.astype(jnp.bfloat16), w.astype(jnp.bfloat16), (s, s), [(1, 1), (1, 1)],
            dimension_numbers=("NCHW", "OIHW", "NCHW"),
            preferred_element_type=jnp.float32)

    def conv1x1(x, w_cc, ci, co, s):
        w = w_cc.reshape(1, 1, ci, co).transpose(3, 2, 0, 1)
        return lax.conv_general_dilated(
            x.astype(jnp.bfloat16), w.astype(jnp.bfloat16), (s, s), [(0, 0), (0, 0)],
            dimension_numbers=("NCHW", "OIHW", "NCHW"),
            preferred_element_type=jnp.float32)

    def bn(conv_f32, g, b):
        mean = jnp.mean(conv_f32, axis=(0, 2, 3), keepdims=True)
        var = jnp.mean((conv_f32 - mean) ** 2, axis=(0, 2, 3), keepdims=True)
        xq = conv_f32.astype(jnp.bfloat16).astype(jnp.float32)   # kernel stores conv in bf16
        return (g.reshape(1, -1, 1, 1) * (xq - mean) * lax.rsqrt(var + EPS)
                + b.reshape(1, -1, 1, 1))

    out1 = jax.nn.relu(bn(conv3x3(xb, raw["w1"], cin, cout, stride), raw["g1"], raw["b1"]))
    out1 = out1.astype(jnp.bfloat16)              # bn1 output stored bf16 (feeds bf16 conv2)
    out = bn(conv3x3(out1, raw["w2"], cout, cout, 1), raw["g2"], raw["b2"])
    if "ws" in raw:
        sc = bn(conv1x1(xb, raw["ws"], cin, cout, stride), raw["gs"], raw["bs"])
    else:
        sc = xb.astype(jnp.float32)               # kernel's identity residual is bf16(x)
    return jax.nn.relu(out + sc)


# --------------------------- main ---------------------------

if __name__ == "__main__":
    key = jax.random.PRNGKey(0)
    kx1, kp1, kx2, kp2 = jax.random.split(key, 4)

    configs = [
        # (keys, in_planes, planes, stride, spatial)
        ((kx1, kp1), 4, 8, 2, 16),   # conv-shortcut path (stride != 1, Cin != planes)
        ((kx2, kp2), 8, 8, 1, 16),   # identity-shortcut path
    ]

    for (kx, kp), in_planes, planes, stride, hw in configs:
        x = jax.random.normal(kx, (2, in_planes, hw, hw), jnp.float32)   # NCHW, like PyTorch
        raw = init_params(kp, in_planes, planes, stride)
        params = prepare_params(raw)       # one-time weight pad + bf16 cast, outside the jit path

        fwd = jax.jit(functools.partial(basic_block_forward, planes=planes, stride=stride))
        out = jax.block_until_ready(fwd(x, params))

        ref = ref_forward(x, raw, stride)
        ho = hw // stride
        assert out.shape == ref.shape == (2, planes, ho, ho)
        np.testing.assert_allclose(np.asarray(out), np.asarray(ref), rtol=1e-2, atol=1e-2)

    print("KERNEL_OK")
</pallas_src>

<mosaic_0001>
module attributes {stable_mosaic.version = 11 : i64} {
  func.func @_conv_stats_kernel(%arg0: i32, %arg1: memref<128x36xbf16, #tpu.memory_space<vmem>>, %arg2: memref<36x128xbf16, #tpu.memory_space<vmem>>, %arg3: memref<128x128xbf16, #tpu.memory_space<vmem>>, %arg4: memref<1x1x128xf32, #tpu.memory_space<vmem>>, %arg5: memref<1x1x128xf32, #tpu.memory_space<vmem>>) attributes {dimension_semantics = [#tpu.dimension_semantics<parallel>], iteration_bounds = array<i64: 1>, scalar_prefetch = 0 : i64, scratch_operands = 0 : i64, tpu.core_type = #tpu.core_type<tc>, window_params = [{transform_indices = @transform_0, window_bounds = array<i64: 128, 36>}, {pipeline_mode = #tpu.pipeline_mode<synchronous>, transform_indices = @transform_1, window_bounds = array<i64: 36, 128>}, {transform_indices = @transform_2, window_bounds = array<i64: 128, 128>}, {transform_indices = @transform_3, window_bounds = array<i64: 1, 1, 128>}, {transform_indices = @transform_4, window_bounds = array<i64: 1, 1, 128>}]} {
    %c0 = arith.constant 0 : index
    %c0_0 = arith.constant 0 : index
    %0 = vector.load %arg1[%c0, %c0_0] : memref<128x36xbf16, #tpu.memory_space<vmem>>, vector<128x36xbf16>
    %c0_1 = arith.constant 0 : index
    %c0_2 = arith.constant 0 : index
    %1 = vector.load %arg2[%c0_1, %c0_2] : memref<36x128xbf16, #tpu.memory_space<vmem>>, vector<36x128xbf16>
    %cst = arith.constant dense<0.000000e+00> : vector<128x128xf32>
    %2 = tpu.matmul %0, %1, %cst {dimension_numbers = #tpu.dot_dimension_numbers<[1], [0], [0], [1], [0, 0, 1, 1], [], []>} : vector<128x36xbf16>, vector<36x128xbf16>, vector<128x128xf32> -> vector<128x128xf32>
    %3 = arith.truncf %2 : vector<128x128xf32> to vector<128x128xbf16>
    %c0_3 = arith.constant 0 : index
    %c0_4 = arith.constant 0 : index
    %4 = vector.load %arg3[%c0_3, %c0_4] : memref<128x128xbf16, #tpu.memory_space<vmem>>, vector<128x128xbf16>
    tpu.vector_store %arg3[%c0_3, %c0_4], %3 {strides = array<i32>} : memref<128x128xbf16, #tpu.memory_space<vmem>>, vector<128x128xbf16>,
    %cst_5 = arith.constant dense<0.000000e+00> : vector<128xf32>
    %5 = vector.multi_reduction <add>, %2, %cst_5 [0] : vector<128x128xf32> to vector<128xf32>
    %6 = vector.shape_cast %5 : vector<128xf32> to vector<1x128xf32>
    %c0_6 = arith.constant 0 : index
    %c0_7 = arith.constant 0 : index
    %c0_8 = arith.constant 0 : index
    %7 = vector.load %arg4[%c0_6, %c0_7, %c0_8] : memref<1x1x128xf32, #tpu.memory_space<vmem>>, vector<1x1x128xf32>
    %8 = vector.shape_cast %7 : vector<1x1x128xf32> to vector<1x128xf32>
    %9 = vector.shape_cast %6 : vector<1x128xf32> to vector<1x1x128xf32>
    tpu.vector_store %arg4[%c0_6, %c0_7, %c0_8], %9 {strides = array<i32>} : memref<1x1x128xf32, #tpu.memory_space<vmem>>, vector<1x1x128xf32>,
    %10 = arith.mulf %2, %2 : vector<128x128xf32>
    %cst_9 = arith.constant dense<0.000000e+00> : vector<128xf32>
    %11 = vector.multi_reduction <add>, %10, %cst_9 [0] : vector<128x128xf32> to vector<128xf32>
    %12 = vector.shape_cast %11 : vector<128xf32> to vector<1x128xf32>
    %c0_10 = arith.constant 0 : index
    %c0_11 = arith.constant 0 : index
    %c0_12 = arith.constant 0 : index
    %13 = vector.load %arg5[%c0_10, %c0_11, %c0_12] : memref<1x1x128xf32, #tpu.memory_space<vmem>>, vector<1x1x128xf32>
    %14 = vector.shape_cast %13 : vector<1x1x128xf32> to vector<1x128xf32>
    %15 = vector.shape_cast %12 : vector<1x128xf32> to vector<1x1x128xf32>
    tpu.vector_store %arg5[%c0_10, %c0_11, %c0_12], %15 {strides = array<i32>} : memref<1x1x128xf32, #tpu.memory_space<vmem>>, vector<1x1x128xf32>,
    return
  }
  func.func @transform_0(%arg0: i32) -> (i32, i32) {
    %c0_i32 = arith.constant 0 : i32
    %c0_i32_0 = arith.constant 0 : i32
    return %arg0, %c0_i32 : i32, i32
  }
  func.func @transform_1(%arg0: i32) -> (i32, i32) {
    %c0_i32 = arith.constant 0 : i32
    %c0_i32_0 = arith.constant 0 : i32
    %c0_i32_1 = arith.constant 0 : i32
    return %c0_i32, %c0_i32_0 : i32, i32
  }
  func.func @transform_2(%arg0: i32) -> (i32, i32) {
    %c0_i32 = arith.constant 0 : i32
    %c0_i32_0 = arith.constant 0 : i32
    return %arg0, %c0_i32 : i32, i32
  }
  func.func @transform_3(%arg0: i32) -> (i32, i32, i32) {
    %c0_i32 = arith.constant 0 : i32
    %c0_i32_0 = arith.constant 0 : i32
    %c0_i32_1 = arith.constant 0 : i32
    return %arg0, %c0_i32, %c0_i32_0 : i32, i32, i32
  }
  func.func @transform_4(%arg0: i32) -> (i32, i32, i32) {
    %c0_i32 = arith.constant 0 : i32
    %c0_i32_0 = arith.constant 0 : i32
    %c0_i32_1 = arith.constant 0 : i32
    return %arg0, %c0_i32, %c0_i32_0 : i32, i32, i32
  }
}

module attributes {stable_mosaic.version = 11 : i64} {
  func.func @_bn_relu_kernel(%arg0: i32, %arg1: memref<128x128xbf16, #tpu.memory_space<vmem>>, %arg2: memref<1x128xf32, #tpu.memory_space<vmem>>, %arg3: memref<1x128xf32, #tpu.memory_space<vmem>>, %arg4: memref<128x128xbf16, #tpu.memory_space<vmem>>) attributes {dimension_semantics = [#tpu.dimension_semantics<parallel>], iteration_bounds = array<i64: 1>, scalar_prefetch = 0 : i64, scratch_operands = 0 : i64, tpu.core_type = #tpu.core_type<tc>, window_params = [{transform_indices = @transform_0, window_bounds = array<i64: 128, 128>}, {pipeline_mode = #tpu.pipeline_mode<synchronous>, transform_indices = @transform_1, window_bounds = array<i64: 1, 128>}, {pipeline_mode = #tpu.pipeline_mode<synchronous>, transform_indices = @transform_2, window_bounds = array<i64: 1, 128>}, {transform_indices = @transform_3, window_bounds = array<i64: 128, 128>}]} {
    %c0 = arith.constant 0 : index
    %c0_0 = arith.constant 0 : index
    %0 = vector.load %arg1[%c0, %c0_0] : memref<128x128xbf16, #tpu.memory_space<vmem>>, vector<128x128xbf16>
    %1 = arith.extf %0 : vector<128x128xbf16> to vector<128x128xf32>
    %c0_1 = arith.constant 0 : index
    %c0_2 = arith.constant 0 : index
    %2 = vector.load %arg2[%c0_1, %c0_2] : memref<1x128xf32, #tpu.memory_space<vmem>>, vector<1x128xf32>
    %3 = vector.broadcast %2 : vector<1x128xf32> to vector<128x128xf32>
    %4 = arith.mulf %1, %3 : vector<128x128xf32>
    %c0_3 = arith.constant 0 : index
    %c0_4 = arith.constant 0 : index
    %5 = vector.load %arg3[%c0_3, %c0_4] : memref<1x128xf32, #tpu.memory_space<vmem>>, vector<1x128xf32>
    %6 = vector.broadcast %5 : vector<1x128xf32> to vector<128x128xf32>
    %7 = arith.addf %4, %6 : vector<128x128xf32>
    %cst = arith.constant 0.000000e+00 : f32
    %8 = vector.broadcast %cst : f32 to vector<128x128xf32>
    %9 = arith.maximumf %7, %8 : vector<128x128xf32>
    %10 = arith.truncf %9 : vector<128x128xf32> to vector<128x128xbf16>
    %c0_5 = arith.constant 0 : index
    %c0_6 = arith.constant 0 : index
    %11 = vector.load %arg4[%c0_5, %c0_6] : memref<128x128xbf16, #tpu.memory_space<vmem>>, vector<128x128xbf16>
    tpu.vector_store %arg4[%c0_5, %c0_6], %10 {strides = array<i32>} : memref<128x128xbf16, #tpu.memory_space<vmem>>, vector<128x128xbf16>,
    return
  }
  func.func @transform_0(%arg0: i32) -> (i32, i32) {
    %c0_i32 = arith.constant 0 : i32
    %c0_i32_0 = arith.constant 0 : i32
    return %arg0, %c0_i32 : i32, i32
  }
  func.func @transform_1(%arg0: i32) -> (i32, i32) {
    %c0_i32 = arith.constant 0 : i32
    %c0_i32_0 = arith.constant 0 : i32
    %c0_i32_1 = arith.constant 0 : i32
    return %c0_i32, %c0_i32_0 : i32, i32
  }
  func.func @transform_2(%arg0: i32) -> (i32, i32) {
    %c0_i32 = arith.constant 0 : i32
    %c0_i32_0 = arith.constant 0 : i32
    %c0_i32_1 = arith.constant 0 : i32
    return %c0_i32, %c0_i32_0 : i32, i32
  }
  func.func @transform_3(%arg0: i32) -> (i32, i32) {
    %c0_i32 = arith.constant 0 : i32
    %c0_i32_0 = arith.constant 0 : i32
    return %arg0, %c0_i32 : i32, i32
  }
}

module attributes {stable_mosaic.version = 11 : i64} {
  func.func @_conv_stats_kernel(%arg0: i32, %arg1: memref<128x72xbf16, #tpu.memory_space<vmem>>, %arg2: memref<72x128xbf16, #tpu.memory_space<vmem>>, %arg3: memref<128x128xbf16, #tpu.memory_space<vmem>>, %arg4: memref<1x1x128xf32, #tpu.memory_space<vmem>>, %arg5: memref<1x1x128xf32, #tpu.memory_space<vmem>>) attributes {dimension_semantics = [#tpu.dimension_semantics<parallel>], iteration_bounds = array<i64: 1>, scalar_prefetch = 0 : i64, scratch_operands = 0 : i64, tpu.core_type = #tpu.core_type<tc>, window_params = [{transform_indices = @transform_0, window_bounds = array<i64: 128, 72>}, {pipeline_mode = #tpu.pipeline_mode<synchronous>, transform_indices = @transform_1, window_bounds = array<i64: 72, 128>}, {transform_indices = @transform_2, window_bounds = array<i64: 128, 128>}, {transform_indices = @transform_3, window_bounds = array<i64: 1, 1, 128>}, {transform_indices = @transform_4, window_bounds = array<i64: 1, 1, 128>}]} {
    %c0 = arith.constant 0 : index
    %c0_0 = arith.constant 0 : index
    %0 = vector.load %arg1[%c0, %c0_0] : memref<128x72xbf16, #tpu.memory_space<vmem>>, vector<128x72xbf16>
    %c0_1 = arith.constant 0 : index
    %c0_2 = arith.constant 0 : index
    %1 = vector.load %arg2[%c0_1, %c0_2] : memref<72x128xbf16, #tpu.memory_space<vmem>>, vector<72x128xbf16>
    %cst = arith.constant dense<0.000000e+00> : vector<128x128xf32>
    %2 = tpu.matmul %0, %1, %cst {dimension_numbers = #tpu.dot_dimension_numbers<[1], [0], [0], [1], [0, 0, 1, 1], [], []>} : vector<128x72xbf16>, vector<72x128xbf16>, vector<128x128xf32> -> vector<128x128xf32>
    %3 = arith.truncf %2 : vector<128x128xf32> to vector<128x128xbf16>
    %c0_3 = arith.constant 0 : index
    %c0_4 = arith.constant 0 : index
    %4 = vector.load %arg3[%c0_3, %c0_4] : memref<128x128xbf16, #tpu.memory_space<vmem>>, vector<128x128xbf16>
    tpu.vector_store %arg3[%c0_3, %c0_4], %3 {strides = array<i32>} : memref<128x128xbf16, #tpu.memory_space<vmem>>, vector<128x128xbf16>,
    %cst_5 = arith.constant dense<0.000000e+00> : vector<128xf32>
    %5 = vector.multi_reduction <add>, %2, %cst_5 [0] : vector<128x128xf32> to vector<128xf32>
    %6 = vector.shape_cast %5 : vector<128xf32> to vector<1x128xf32>
    %c0_6 = arith.constant 0 : index
    %c0_7 = arith.constant 0 : index
    %c0_8 = arith.constant 0 : index
    %7 = vector.load %arg4[%c0_6, %c0_7, %c0_8] : memref<1x1x128xf32, #tpu.memory_space<vmem>>, vector<1x1x128xf32>
    %8 = vector.shape_cast %7 : vector<1x1x128xf32> to vector<1x128xf32>
    %9 = vector.shape_cast %6 : vector<1x128xf32> to vector<1x1x128xf32>
    tpu.vector_store %arg4[%c0_6, %c0_7, %c0_8], %9 {strides = array<i32>} : memref<1x1x128xf32, #tpu.memory_space<vmem>>, vector<1x1x128xf32>,
    %10 = arith.mulf %2, %2 : vector<128x128xf32>
    %cst_9 = arith.constant dense<0.000000e+00> : vector<128xf32>
    %11 = vector.multi_reduction <add>, %10, %cst_9 [0] : vector<128x128xf32> to vector<128xf32>
    %12 = vector.shape_cast %11 : vector<128xf32> to vector<1x128xf32>
    %c0_10 = arith.constant 0 : index
    %c0_11 = arith.constant 0 : index
    %c0_12 = arith.constant 0 : index
    %13 = vector.load %arg5[%c0_10, %c0_11, %c0_12] : memref<1x1x128xf32, #tpu.memory_space<vmem>>, vector<1x1x128xf32>
    %14 = vector.shape_cast %13 : vector<1x1x128xf32> to vector<1x128xf32>
    %15 = vector.shape_cast %12 : vector<1x128xf32> to vector<1x1x128xf32>
    tpu.vector_store %arg5[%c0_10, %c0_11, %c0_12], %15 {strides = array<i32>} : memref<1x1x128xf32, #tpu.memory_space<vmem>>, vector<1x1x128xf32>,
    return
  }
  func.func @transform_0(%arg0: i32) -> (i32, i32) {
    %c0_i32 = arith.constant 0 : i32
    %c0_i32_0 = arith.constant 0 : i32
    return %arg0, %c0_i32 : i32, i32
  }
  func.func @transform_1(%arg0: i32) -> (i32, i32) {
    %c0_i32 = arith.constant 0 : i32
    %c0_i32_0 = arith.constant 0 : i32
    %c0_i32_1 = arith.constant 0 : i32
    return %c0_i32, %c0_i32_0 : i32, i32
  }
  func.func @transform_2(%arg0: i32) -> (i32, i32) {
    %c0_i32 = arith.constant 0 : i32
    %c0_i32_0 = arith.constant 0 : i32
    return %arg0, %c0_i32 : i32, i32
  }
  func.func @transform_3(%arg0: i32) -> (i32, i32, i32) {
    %c0_i32 = arith.constant 0 : i32
    %c0_i32_0 = arith.constant 0 : i32
    %c0_i32_1 = arith.constant 0 : i32
    return %arg0, %c0_i32, %c0_i32_0 : i32, i32, i32
  }
  func.func @transform_4(%arg0: i32) -> (i32, i32, i32) {
    %c0_i32 = arith.constant 0 : i32
    %c0_i32_0 = arith.constant 0 : i32
    %c0_i32_1 = arith.constant 0 : i32
    return %arg0, %c0_i32, %c0_i32_0 : i32, i32, i32
  }
}

module attributes {stable_mosaic.version = 11 : i64} {
  func.func @_bn_res_relu_kernel(%arg0: i32, %arg1: memref<128x128xbf16, #tpu.memory_space<vmem>>, %arg2: memref<1x128xf32, #tpu.memory_space<vmem>>, %arg3: memref<1x128xf32, #tpu.memory_space<vmem>>, %arg4: memref<128x128xbf16, #tpu.memory_space<vmem>>, %arg5: memref<1x128xf32, #tpu.memory_space<vmem>>, %arg6: memref<1x128xf32, #tpu.memory_space<vmem>>, %arg7: memref<128x128xf32, #tpu.memory_space<vmem>>) attributes {dimension_semantics = [#tpu.dimension_semantics<parallel>], iteration_bounds = array<i64: 1>, scalar_prefetch = 0 : i64, scratch_operands = 0 : i64, tpu.core_type = #tpu.core_type<tc>, window_params = [{transform_indices = @transform_0, window_bounds = array<i64: 128, 128>}, {pipeline_mode = #tpu.pipeline_mode<synchronous>, transform_indices = @transform_1, window_bounds = array<i64: 1, 128>}, {pipeline_mode = #tpu.pipeline_mode<synchronous>, transform_indices = @transform_2, window_bounds = array<i64: 1, 128>}, {transform_indices = @transform_3, window_bounds = array<i64: 128, 128>}, {pipeline_mode = #tpu.pipeline_mode<synchronous>, transform_indices = @transform_4, window_bounds = array<i64: 1, 128>}, {pipeline_mode = #tpu.pipeline_mode<synchronous>, transform_indices = @transform_5, window_bounds = array<i64: 1, 128>}, {transform_indices = @transform_6, window_bounds = array<i64: 128, 128>}]} {
    %c0 = arith.constant 0 : index
    %c0_0 = arith.constant 0 : index
    %0 = vector.load %arg1[%c0, %c0_0] : memref<128x128xbf16, #tpu.memory_space<vmem>>, vector<128x128xbf16>
    %1 = arith.extf %0 : vector<128x128xbf16> to vector<128x128xf32>
    %c0_1 = arith.constant 0 : index
    %c0_2 = arith.constant 0 : index
    %2 = vector.load %arg2[%c0_1, %c0_2] : memref<1x128xf32, #tpu.memory_space<vmem>>, vector<1x128xf32>
    %3 = vector.broadcast %2 : vector<1x128xf32> to vector<128x128xf32>
    %4 = arith.mulf %1, %3 : vector<128x128xf32>
    %c0_3 = arith.constant 0 : index
    %c0_4 = arith.constant 0 : index
    %5 = vector.load %arg3[%c0_3, %c0_4] : memref<1x128xf32, #tpu.memory_space<vmem>>, vector<1x128xf32>
    %6 = vector.broadcast %5 : vector<1x128xf32> to vector<128x128xf32>
    %7 = arith.addf %4, %6 : vector<128x128xf32>
    %c0_5 = arith.constant 0 : index
    %c0_6 = arith.constant 0 : index
    %8 = vector.load %arg4[%c0_5, %c0_6] : memref<128x128xbf16, #tpu.memory_space<vmem>>, vector<128x128xbf16>
    %9 = arith.extf %8 : vector<128x128xbf16> to vector<128x128xf32>
    %c0_7 = arith.constant 0 : index
    %c0_8 = arith.constant 0 : index
    %10 = vector.load %arg5[%c0_7, %c0_8] : memref<1x128xf32, #tpu.memory_space<vmem>>, vector<1x128xf32>
    %11 = vector.broadcast %10 : vector<1x128xf32> to vector<128x128xf32>
    %12 = arith.mulf %9, %11 : vector<128x128xf32>
    %13 = arith.addf %7, %12 : vector<128x128xf32>
    %c0_9 = arith.constant 0 : index
    %c0_10 = arith.constant 0 : index
    %14 = vector.load %arg6[%c0_9, %c0_10] : memref<1x128xf32, #tpu.memory_space<vmem>>, vector<1x128xf32>
    %15 = vector.broadcast %14 : vector<1x128xf32> to vector<128x128xf32>
    %16 = arith.addf %13, %15 : vector<128x128xf32>
    %cst = arith.constant 0.000000e+00 : f32
    %17 = vector.broadcast %cst : f32 to vector<128x128xf32>
    %18 = arith.maximumf %16, %17 : vector<128x128xf32>
    %c0_11 = arith.constant 0 : index
    %c0_12 = arith.constant 0 : index
    %19 = vector.load %arg7[%c0_11, %c0_12] : memref<128x128xf32, #tpu.memory_space<vmem>>, vector<128x128xf32>
    tpu.vector_store %arg7[%c0_11, %c0_12], %18 {strides = array<i32>} : memref<128x128xf32, #tpu.memory_space<vmem>>, vector<128x128xf32>,
    return
  }
  func.func @transform_0(%arg0: i32) -> (i32, i32) {
    %c0_i32 = arith.constant 0 : i32
    %c0_i32_0 = arith.constant 0 : i32
    return %arg0, %c0_i32 : i32, i32
  }
  func.func @transform_1(%arg0: i32) -> (i32, i32) {
    %c0_i32 = arith.constant 0 : i32
    %c0_i32_0 = arith.constant 0 : i32
    %c0_i32_1 = arith.constant 0 : i32
    return %c0_i32, %c0_i32_0 : i32, i32
  }
  func.func @transform_2(%arg0: i32) -> (i32, i32) {
    %c0_i32 = arith.constant 0 : i32
    %c0_i32_0 = arith.constant 0 : i32
    %c0_i32_1 = arith.constant 0 : i32
    return %c0_i32, %c0_i32_0 : i32, i32
  }
  func.func @transform_3(%arg0: i32) -> (i32, i32) {
    %c0_i32 = arith.constant 0 : i32
    %c0_i32_0 = arith.constant 0 : i32
    return %arg0, %c0_i32 : i32, i32
  }
  func.func @transform_4(%arg0: i32) -> (i32, i32) {
    %c0_i32 = arith.constant 0 : i32
    %c0_i32_0 = arith.constant 0 : i32
    %c0_i32_1 = arith.constant 0 : i32
    return %c0_i32, %c0_i32_0 : i32, i32
  }
  func.func @transform_5(%arg0: i32) -> (i32, i32) {
    %c0_i32 = arith.constant 0 : i32
    %c0_i32_0 = arith.constant 0 : i32
    %c0_i32_1 = arith.constant 0 : i32
    return %c0_i32, %c0_i32_0 : i32, i32
  }
  func.func @transform_6(%arg0: i32) -> (i32, i32) {
    %c0_i32 = arith.constant 0 : i32
    %c0_i32_0 = arith.constant 0 : i32
    return %arg0, %c0_i32 : i32, i32
  }
}

module attributes {stable_mosaic.version = 11 : i64} {
  func.func @_conv_stats_kernel(%arg0: i32, %arg1: memref<128x4xbf16, #tpu.memory_space<vmem>>, %arg2: memref<4x128xbf16, #tpu.memory_space<vmem>>, %arg3: memref<128x128xbf16, #tpu.memory_space<vmem>>, %arg4: memref<1x1x128xf32, #tpu.memory_space<vmem>>, %arg5: memref<1x1x128xf32, #tpu.memory_space<vmem>>) attributes {dimension_semantics = [#tpu.dimension_semantics<parallel>], iteration_bounds = array<i64: 1>, scalar_prefetch = 0 : i64, scratch_operands = 0 : i64, tpu.core_type = #tpu.core_type<tc>, window_params = [{transform_indices = @transform_0, window_bounds = array<i64: 128, 4>}, {pipeline_mode = #tpu.pipeline_mode<synchronous>, transform_indices = @transform_1, window_bounds = array<i64: 4, 128>}, {transform_indices = @transform_2, window_bounds = array<i64: 128, 128>}, {transform_indices = @transform_3, window_bounds = array<i64: 1, 1, 128>}, {transform_indices = @transform_4, window_bounds = array<i64: 1, 1, 128>}]} {
    %c0 = arith.constant 0 : index
    %c0_0 = arith.constant 0 : index
    %0 = vector.load %arg1[%c0, %c0_0] : memref<128x4xbf16, #tpu.memory_space<vmem>>, vector<128x4xbf16>
    %c0_1 = arith.constant 0 : index
    %c0_2 = arith.constant 0 : index
    %1 = vector.load %arg2[%c0_1, %c0_2] : memref<4x128xbf16, #tpu.memory_space<vmem>>, vector<4x128xbf16>
    %cst = arith.constant dense<0.000000e+00> : vector<128x128xf32>
    %2 = tpu.matmul %0, %1, %cst {dimension_numbers = #tpu.dot_dimension_numbers<[1], [0], [0], [1], [0, 0, 1, 1], [], []>} : vector<128x4xbf16>, vector<4x128xbf16>, vector<128x128xf32> -> vector<128x128xf32>
    %3 = arith.truncf %2 : vector<128x128xf32> to vector<128x128xbf16>
    %c0_3 = arith.constant 0 : index
    %c0_4 = arith.constant 0 : index
    %4 = vector.load %arg3[%c0_3, %c0_4] : memref<128x128xbf16, #tpu.memory_space<vmem>>, vector<128x128xbf16>
    tpu.vector_store %arg3[%c0_3, %c0_4], %3 {strides = array<i32>} : memref<128x128xbf16, #tpu.memory_space<vmem>>, vector<128x128xbf16>,
    %cst_5 = arith.constant dense<0.000000e+00> : vector<128xf32>
    %5 = vector.multi_reduction <add>, %2, %cst_5 [0] : vector<128x128xf32> to vector<128xf32>
    %6 = vector.shape_cast %5 : vector<128xf32> to vector<1x128xf32>
    %c0_6 = arith.constant 0 : index
    %c0_7 = arith.constant 0 : index
    %c0_8 = arith.constant 0 : index
    %7 = vector.load %arg4[%c0_6, %c0_7, %c0_8] : memref<1x1x128xf32, #tpu.memory_space<vmem>>, vector<1x1x128xf32>
    %8 = vector.shape_cast %7 : vector<1x1x128xf32> to vector<1x128xf32>
    %9 = vector.shape_cast %6 : vector<1x128xf32> to vector<1x1x128xf32>
    tpu.vector_store %arg4[%c0_6, %c0_7, %c0_8], %9 {strides = array<i32>} : memref<1x1x128xf32, #tpu.memory_space<vmem>>, vector<1x1x128xf32>,
    %10 = arith.mulf %2, %2 : vector<128x128xf32>
    %cst_9 = arith.constant dense<0.000000e+00> : vector<128xf32>
    %11 = vector.multi_reduction <add>, %10, %cst_9 [0] : vector<128x128xf32> to vector<128xf32>
    %12 = vector.shape_cast %11 : vector<128xf32> to vector<1x128xf32>
    %c0_10 = arith.constant 0 : index
    %c0_11 = arith.constant 0 : index
    %c0_12 = arith.constant 0 : index
    %13 = vector.load %arg5[%c0_10, %c0_11, %c0_12] : memref<1x1x128xf32, #tpu.memory_space<vmem>>, vector<1x1x128xf32>
    %14 = vector.shape_cast %13 : vector<1x1x128xf32> to vector<1x128xf32>
    %15 = vector.shape_cast %12 : vector<1x128xf32> to vector<1x1x128xf32>
    tpu.vector_store %arg5[%c0_10, %c0_11, %c0_12], %15 {strides = array<i32>} : memref<1x1x128xf32, #tpu.memory_space<vmem>>, vector<1x1x128xf32>,
    return
  }
  func.func @transform_0(%arg0: i32) -> (i32, i32) {
    %c0_i32 = arith.constant 0 : i32
    %c0_i32_0 = arith.constant 0 : i32
    return %arg0, %c0_i32 : i32, i32
  }
  func.func @transform_1(%arg0: i32) -> (i32, i32) {
    %c0_i32 = arith.constant 0 : i32
    %c0_i32_0 = arith.constant 0 : i32
    %c0_i32_1 = arith.constant 0 : i32
    return %c0_i32, %c0_i32_0 : i32, i32
  }
  func.func @transform_2(%arg0: i32) -> (i32, i32) {
    %c0_i32 = arith.constant 0 : i32
    %c0_i32_0 = arith.constant 0 : i32
    return %arg0, %c0_i32 : i32, i32
  }
  func.func @transform_3(%arg0: i32) -> (i32, i32, i32) {
    %c0_i32 = arith.constant 0 : i32
    %c0_i32_0 = arith.constant 0 : i32
    %c0_i32_1 = arith.constant 0 : i32
    return %arg0, %c0_i32, %c0_i32_0 : i32, i32, i32
  }
  func.func @transform_4(%arg0: i32) -> (i32, i32, i32) {
    %c0_i32 = arith.constant 0 : i32
    %c0_i32_0 = arith.constant 0 : i32
    %c0_i32_1 = arith.constant 0 : i32
    return %arg0, %c0_i32, %c0_i32_0 : i32, i32, i32
  }
}

</mosaic_0001>

<bundles_post_ra>
// kernel: basic_block_forward.6
= control target key start
LH: loop header
LB: loop body
LE: loop exit
PB: predicated region body
PF: predicated region fallthrough
CT: control target
= control target key end

     0   :  { %s422_s0 = inlined_call_operand.vmem [shape: bf16[128,128], index: 0, kind: input, shape index: {}]   ;;  %s423_s1 = inlined_call_operand.vmem [shape: f32[1,128], index: 1, kind: input, shape index: {}]   ;;  %s424_s2 = inlined_call_operand.vmem [shape: f32[1,128], index: 2, kind: input, shape index: {}]   ;;  %s425_s3 = inlined_call_operand.vmem [shape: bf16[128,128], index: 3, kind: output, shape index: {}]  }
   0x1   :  { %v227_v0 = vld [vmem:[%s422_s0] sm:$0xff]   ;;  %v298_v4 = vld [vmem:[%s422_s0 + $0x8] sm:$0xff]   ;;  %v299_v5 = vld [vmem:[%s422_s0 + $0x10] sm:$0xff]  }
   0x2   :  { %v338_v1 = vld [vmem:[%s423_s1] ss:$0 sm:$0xff]  ;;  %v228_v2 = vunpack.c.l.bf16 %v227_v0  ;;  %v229_v3 = vunpack.c.h.bf16 %v227_v0  ;;  %v300_v6 = vld [vmem:[%s422_s0 + $0x18] sm:$0xff]   ;;  %v232_v8 = vunpack.c.l.bf16 %v298_v4  ;;  %v233_v9 = vunpack.c.h.bf16 %v298_v4  ;;  %v302_v33 = vld [vmem:[%s422_s0 + $0x28] sm:$0xff]  }
   0x3   :  { %v352_v7 = vld [vmem:[%s424_s2] ss:$0 sm:$0xff]  ;;  %v236_v10 = vunpack.c.l.bf16 %v299_v5  ;;  %v237_v11 = vunpack.c.h.bf16 %v299_v5  ;;  %v240_v14 = vunpack.c.l.bf16 %v300_v6  ;;  %v241_v15 = vunpack.c.h.bf16 %v300_v6  ;;  %v303_v38 = vld [vmem:[%s422_s0 + $0x30] sm:$0xff]   ;;  %v304_v43 = vld [vmem:[%s422_s0 + $0x38] sm:$0xff]  }
   0x4   :  { %v53_v12 = vmul.f32 %v228_v2, %v338_v1  ;;  %v54_v13 = vmul.f32 %v229_v3, %v338_v1  ;;  %v55_v16 = vmul.f32 %v232_v8, %v338_v1  ;;  %v56_v17 = vmul.f32 %v233_v9, %v338_v1  ;;  %v301_v28 = vld [vmem:[%s422_s0 + $0x20] sm:$0xff]  }
   0x5   :  { %v57_v18 = vmul.f32 %v236_v10, %v338_v1  ;;  %v58_v19 = vmul.f32 %v237_v11, %v338_v1  ;;  %v59_v22 = vmul.f32 %v240_v14, %v338_v1  ;;  %v60_v23 = vmul.f32 %v241_v15, %v338_v1 }
   0x6   :  { %v76_v20 = vadd.f32 %v352_v7, %v53_v12  ;;  %v77_v21 = vadd.f32 %v352_v7, %v54_v13  ;;  %v78_v24 = vadd.f32 %v352_v7, %v55_v16  ;;  %v79_v25 = vadd.f32 %v352_v7, %v56_v17 }
   0x7   :  { %v80_v26 = vadd.f32 %v352_v7, %v57_v18  ;;  %v81_v27 = vadd.f32 %v352_v7, %v58_v19  ;;  %v82_v31 = vadd.f32 %v352_v7, %v59_v22  ;;  %v83_v32 = vadd.f32 %v352_v7, %v60_v23 }
   0x8   :  { %v92_v29 = vmax.f32 %v76_v20, 0.0  ;;  %v93_v30 = vmax.f32 %v77_v21, 0.0  ;;  %v94_v34 = vmax.f32 %v78_v24, 0.0  ;;  %v95_v35 = vmax.f32 %v79_v25, 0.0 }
   0x9   :  { %v96_v36 = vmax.f32 %v80_v26, 0.0  ;;  %v97_v37 = vmax.f32 %v81_v27, 0.0  ;;  %v98_v40 = vmax.f32 %v82_v31, 0.0  ;;  %v99_v41 = vmax.f32 %v83_v32, 0.0 }
   0xa   :  { %v261_v39 = vpack.c.bf16 %v93_v30, %v92_v29  ;;  %v244_v42 = vunpack.c.l.bf16 %v301_v28  ;;  %v266_v44 = vpack.c.bf16 %v95_v35, %v94_v34  ;;  %v245_v46 = vunpack.c.h.bf16 %v301_v28 }
   0xb   :  { %v271_v45 = vpack.c.bf16 %v97_v37, %v96_v36  ;;  %v248_v47 = vunpack.c.l.bf16 %v302_v33  ;;  %v276_v48 = vpack.c.bf16 %v99_v41, %v98_v40  ;;  %v249_v50 = vunpack.c.h.bf16 %v302_v33 }
   0xc   :  { %262 = vst [vmem:[%s425_s3] sm:$0xff] %v261_v39   ;;  %v61_v49 = vmul.f32 %v244_v42, %v338_v1  ;;  %v252_v51 = vunpack.c.l.bf16 %v303_v38  ;;  %305 = vst [vmem:[%s425_s3 + $0x8] sm:$0xff] %v266_v44   ;;  %v62_v52 = vmul.f32 %v245_v46, %v338_v1  ;;  %v253_v54 = vunpack.c.h.bf16 %v303_v38 }
   0xd   :  { %306 = vst [vmem:[%s425_s3 + $0x10] sm:$0xff] %v271_v45   ;;  %v63_v53 = vmul.f32 %v248_v47, %v338_v1  ;;  %v256_v55 = vunpack.c.l.bf16 %v304_v43  ;;  %307 = vst [vmem:[%s425_s3 + $0x18] sm:$0xff] %v276_v48   ;;  %v64_v57 = vmul.f32 %v249_v50, %v338_v1  ;;  %v257_v59 = vunpack.c.h.bf16 %v304_v43 }
   0xe   :  { %v84_v56 = vadd.f32 %v352_v7, %v61_v49  ;;  %v65_v58 = vmul.f32 %v252_v51, %v338_v1  ;;  %v85_v60 = vadd.f32 %v352_v7, %v62_v52  ;;  %v66_v62 = vmul.f32 %v253_v54, %v338_v1 }
   0xf   :  { %v86_v61 = vadd.f32 %v352_v7, %v63_v53  ;;  %v67_v63 = vmul.f32 %v256_v55, %v338_v1  ;;  %v87_v2 = vadd.f32 %v352_v7, %v64_v57  ;;  %v68_v4 = vmul.f32 %v257_v59, %v338_v1 }
  0x10   :  { %v100_v0 = vmax.f32 %v84_v56, 0.0  ;;  %v88_v3 = vadd.f32 %v352_v7, %v65_v58  ;;  %v101_v5 = vmax.f32 %v85_v60, 0.0  ;;  %v89_v8 = vadd.f32 %v352_v7, %v66_v62 }
  0x11   :  { %v102_v6 = vmax.f32 %v86_v61, 0.0  ;;  %v90_v9 = vadd.f32 %v352_v7, %v67_v63  ;;  %v103_v10 = vmax.f32 %v87_v2, 0.0  ;;  %v91_v12 = vadd.f32 %v352_v7, %v68_v4 }
  0x12   :  { %v104_v11 = vmax.f32 %v88_v3, 0.0  ;;  %v281_v13 = vpack.c.bf16 %v101_v5, %v100_v0  ;;  %v105_v14 = vmax.f32 %v89_v8, 0.0 }
  0x13   :  { %v106_v15 = vmax.f32 %v90_v9, 0.0  ;;  %v286_v16 = vpack.c.bf16 %v103_v10, %v102_v6  ;;  %v107_v17 = vmax.f32 %v91_v12, 0.0 }
  0x14   :  { %308 = vst [vmem:[%s425_s3 + $0x20] sm:$0xff] %v281_v13   ;;  %v291_v1 = vpack.c.bf16 %v105_v14, %v104_v11 }
  0x15   :  { %309 = vst [vmem:[%s425_s3 + $0x28] sm:$0xff] %v286_v16   ;;  %v296_v18 = vpack.c.bf16 %v107_v17, %v106_v15 }
  0x16   :  { %310 = vst [vmem:[%s425_s3 + $0x30] sm:$0xff] %v291_v1  }
  0x17   :  { %311 = vst [vmem:[%s425_s3 + $0x38] sm:$0xff] %v296_v18  }

// kernel: basic_block_forward.5
= control target key start
LH: loop header
LB: loop body
LE: loop exit
PB: predicated region body
PF: predicated region fallthrough
CT: control target
= control target key end

     0   :  { %vm91_vm0 = vcmask 293888   ;;  %vm116_vm1 = vcmask 1041408   ;;  %s615_s1 = inlined_call_operand.vmem [shape: bf16[36,128], index: 1, kind: input, shape index: {}]   ;;  %s616_s0 = inlined_call_operand.vmem [shape: bf16[128,36], index: 0, kind: input, shape index: {}]   ;;  %s617_s2 = inlined_call_operand.vmem [shape: bf16[128,128], index: 2, kind: output, shape index: {0}]   ;;  %s618_s3 = inlined_call_operand.vmem [shape: f32[1,1,128], index: 3, kind: output, shape index: {1}]   ;;  %s619_s4 = inlined_call_operand.vmem [shape: f32[1,1,128], index: 4, kind: output, shape index: {2}]  }
   0x1   :  { %v508_v0 = vld [vmem:[%s615_s1] sm:$0xff]   ;;  %v509_v1 = vld [vmem:[%s615_s1 + $0x8] sm:$0xff]   ;;  %v510_v2 = vld [vmem:[%s615_s1 + $0x10] ss:$0 sps:$4 sm:$0x33]  }
   0x2   :  { %478 = vmatprep.subr.bf16.mxu0 %v508_v0  ;;  %v511_v3 = vld [vmem:[%s616_s0] sm:$0xff]   ;;  %500 = vmatprep.subr.bf16.mxu1 %v508_v0  ;;  %v118_v5 = vsel %vm116_vm1, %v510_v2, 0  ;;  %v512_v6 = vld [vmem:[%s616_s0 + $0x8] sm:$0xff]   ;;  %v513_v8 = vld [vmem:[%s616_s0 + $0x10] sm:$0xff]  }
   0x3   :  { %479 = vmatpush3.bf16.msra.mxu0 %v508_v0  ;;  %503 = vmatpush3.bf16.msra.mxu1 %v508_v0  ;;  %v515_v4 = vld [vmem:[%s616_s0 + $0x20] sm:$0xff]   ;;  %v516_v7 = vld [vmem:[%s616_s0 + $0x28] sm:$0xff]   ;;  %v517_v9 = vld [vmem:[%s616_s0 + $0x30] sm:$0xff]  }
   0x4   :  { %480 = vmatprep.subr.bf16.mxu0 %v509_v1  ;;  %484 = vmatprep.mubr.msk.bf16.mxu0 %vm91_vm0, %v511_v3  ;;  %v514_v10 = vld [vmem:[%s616_s0 + $0x18] sm:$0xff]  }
   0x5   :  { %501 = vmatprep.subr.bf16.mxu1 %v509_v1  ;;  %492 = vmatprep.mubr.msk.bf16.mxu1 %vm91_vm0, %v515_v4  ;;  %v518_v11 = vld [vmem:[%s616_s0 + $0x38] sm:$0xff]  }
   0x7   :  { %481 = vmatpush3.bf16.msra.mxu0 %v509_v1  ;;  %504 = vmatpush3.bf16.msra.mxu1 %v509_v1 }
   0x8   :  { %506 = vmatprep.subr.msk.bf16.mxu0 %vm116_vm1, %v510_v2  ;;  %507 = vmatprep.subr.msk.bf16.mxu1 %vm116_vm1, %v510_v2 }
   0xb   :  { %483 = vmatpush3.bf16.msra.mxu0 %v118_v5  ;;  %505 = vmatpush3.bf16.msra.mxu1 %v118_v5 }
   0xe   :  { %485 = vmatmul.mubr.msk.bf16.vlgmr.msra.gmra.mrb[0].mxu0 %vm91_vm0, %v512_v6  ;;  %493 = vmatmul.mubr.msk.bf16.vlgmr.msra.gmra.mrb[0].mxu1 %vm91_vm0, %v516_v7 }
   0xf   :  { %488 = vmatprep.mubr.msk.bf16.mxu0 %vm91_vm0, %v513_v8  ;;  %496 = vmatprep.mubr.msk.bf16.mxu1 %vm91_vm0, %v517_v9 }
  0x16   :  { %489 = vmatmul.mubr.msk.bf16.gmra.mrb[4].mxu0 %vm91_vm0, %v514_v10  ;;  %497 = vmatmul.mubr.msk.bf16.gmra.mrb[4].mxu1 %vm91_vm0, %v518_v11 }
  0xe1   :  { %v486_v12 = vpop.f32.mrb[0].mxu0  ;;  %v494_v13 = vpop.f32.mrb[0].mxu1 }
  0xe2   :  { %v154_v14 = vpop.f32.mrb[1].mxu0  ;;  %v186_v15 = vpop.f32.mrb[1].mxu1  ;;  %v321_v27 = vmul.f32 %v486_v12, %v486_v12  ;;  %v329_v63 = vmul.f32 %v494_v13, %v494_v13 }
  0xe3   :  { %v487_v16 = vpop.f32.mrb[2].mxu0  ;;  %v495_v17 = vpop.f32.mrb[2].mxu1  ;;  %v319_v18 = vmul.f32 %v154_v14, %v154_v14  ;;  %v327_v57 = vmul.f32 %v186_v15, %v186_v15 }
  0xe4   :  { %v428_v19 = vpack.c.bf16 %v487_v16, %v486_v12  ;;  %v157_v20 = vpop.f32.mrb[3].mxu0  ;;  %v448_v21 = vpack.c.bf16 %v495_v17, %v494_v13  ;;  %v189_v22 = vpop.f32.mrb[3].mxu1  ;;  %v322_v30 = vmul.f32 %v487_v16, %v487_v16  ;;  %v330_v2 = vmul.f32 %v495_v17, %v495_v17 }
  0xe5   :  { %v423_v23 = vpack.c.bf16 %v157_v20, %v154_v14  ;;  %v297_v24 = vadd.f32 %v157_v20, %v154_v14  ;;  %v320_v25 = vmul.f32 %v157_v20, %v157_v20  ;;  %v443_v26 = vpack.c.bf16 %v189_v22, %v186_v15 }
  0xe6   :  { %460 = vst [vmem:[%s617_s2 + $0x8] sm:$0xff] %v428_v19   ;;  %464 = vst [vmem:[%s617_s2 + $0x28] sm:$0xff] %v448_v21   ;;  %v328_v62 = vmul.f32 %v189_v22, %v189_v22 }
  0xe7   :  { %424 = vst [vmem:[%s617_s2] sm:$0xff] %v423_v23   ;;  %v298_v28 = vadd.f32 %v486_v12, %v297_v24  ;;  %v335_v29 = vadd.f32 %v320_v25, %v319_v18  ;;  %463 = vst [vmem:[%s617_s2 + $0x20] sm:$0xff] %v443_v26  }
  0xe9   :  { %v336_v31 = vadd.f32 %v335_v29, %v321_v27  ;;  %v490_v32 = vpop.f32.mrb[4].mxu0  ;;  %v299_v33 = vadd.f32 %v487_v16, %v298_v28  ;;  %v498_v34 = vpop.f32.mrb[4].mxu1 }
  0xea   :  { %v170_v35 = vpop.f32.mrb[5].mxu0  ;;  %v202_v36 = vpop.f32.mrb[5].mxu1  ;;  %v325_v51 = vmul.f32 %v490_v32, %v490_v32  ;;  %v333_v11 = vmul.f32 %v498_v34, %v498_v34 }
  0xeb   :  { %v300_v37 = vadd.f32 %v299_v33, %v170_v35  ;;  %v323_v38 = vmul.f32 %v170_v35, %v170_v35  ;;  %v337_v39 = vadd.f32 %v336_v31, %v322_v30  ;;  %v491_v40 = vpop.f32.mrb[6].mxu0  ;;  %v499_v41 = vpop.f32.mrb[6].mxu1  ;;  %v331_v5 = vmul.f32 %v202_v36, %v202_v36 }
  0xec   :  { %v438_v42 = vpack.c.bf16 %v491_v40, %v490_v32  ;;  %v173_v43 = vpop.f32.mrb[7].mxu0  ;;  %v458_v44 = vpack.c.bf16 %v499_v41, %v498_v34  ;;  %v205_v45 = vpop.f32.mrb[7].mxu1  ;;  %v326_v54 = vmul.f32 %v491_v40, %v491_v40 }
  0xed   :  { %v338_v46 = vadd.f32 %v337_v39, %v323_v38  ;;  %v433_v47 = vpack.c.bf16 %v173_v43, %v170_v35  ;;  %v301_v48 = vadd.f32 %v300_v37, %v173_v43  ;;  %v324_v49 = vmul.f32 %v173_v43, %v173_v43 }
  0xee   :  { %462 = vst [vmem:[%s617_s2 + $0x18] sm:$0xff] %v438_v42   ;;  %466 = vst [vmem:[%s617_s2 + $0x38] sm:$0xff] %v458_v44   ;;  %v453_v50 = vpack.c.bf16 %v205_v45, %v202_v36  ;;  %v332_v10 = vmul.f32 %v205_v45, %v205_v45 }
  0xef   :  { %461 = vst [vmem:[%s617_s2 + $0x10] sm:$0xff] %v433_v47   ;;  %v302_v52 = vadd.f32 %v490_v32, %v301_v48  ;;  %v339_v53 = vadd.f32 %v338_v46, %v324_v49 }
  0xf0   :  { %465 = vst [vmem:[%s617_s2 + $0x30] sm:$0xff] %v453_v50  }
  0xf1   :  { %v340_v55 = vadd.f32 %v339_v53, %v325_v51  ;;  %v303_v56 = vadd.f32 %v491_v40, %v302_v52 }
  0xf3   :  { %v304_v58 = vadd.f32 %v303_v56, %v186_v15  ;;  %v341_v59 = vadd.f32 %v340_v55, %v326_v54  ;;  %v334_v15 = vmul.f32 %v499_v41, %v499_v41 }
  0xf5   :  { %v342_v60 = vadd.f32 %v341_v59, %v327_v57  ;;  %v305_v61 = vadd.f32 %v304_v58, %v189_v22 }
  0xf7   :  { %v306_v0 = vadd.f32 %v494_v13, %v305_v61  ;;  %v343_v1 = vadd.f32 %v342_v60, %v328_v62 }
  0xf9   :  { %v344_v3 = vadd.f32 %v343_v1, %v329_v63  ;;  %v307_v4 = vadd.f32 %v495_v17, %v306_v0 }
  0xfb   :  { %v308_v6 = vadd.f32 %v307_v4, %v202_v36  ;;  %v345_v7 = vadd.f32 %v344_v3, %v330_v2 }
  0xfd   :  { %v346_v8 = vadd.f32 %v345_v7, %v331_v5  ;;  %v309_v9 = vadd.f32 %v308_v6, %v205_v45 }
  0xff   :  { %v310_v12 = vadd.f32 %v498_v34, %v309_v9  ;;  %v347_v14 = vadd.f32 %v346_v8, %v332_v10 }
 0x101   :  { %v311_v16 = vadd.f32 %v499_v41, %v310_v12  ;;  %v348_v18 = vadd.f32 %v347_v14, %v333_v11 }
 0x103   :  { %v312_v19 = vrot.slane %v311_v16, 4  ;;  %v349_v20 = vadd.f32 %v348_v18, %v334_v15 }
 0x105   :  { %v313_v21 = vadd.f32 %v312_v19, %v311_v16  ;;  %v350_v13 = vrot.slane %v349_v20, 4 }
 0x107   :  { %v314_v22 = vrot.slane %v313_v21, 2  ;;  %v351_v23 = vadd.f32 %v350_v13, %v349_v20 }
 0x109   :  { %v315_v24 = vadd.f32 %v314_v22, %v313_v21  ;;  %v352_v17 = vrot.slane %v351_v23, 2 }
 0x10b   :  { %v316_v25 = vrot.slane %v315_v24, 1  ;;  %v353_v26 = vadd.f32 %v352_v17, %v351_v23 }
 0x10d   :  { %v317_v27 = vadd.f32 %v316_v25, %v315_v24  ;;  %v354_v28 = vrot.slane %v353_v26, 1 }
 0x10f   :  { %318 = vst [vmem:[%s618_s3] sm:$0x1] %v317_v27  ;;  %v355_v29 = vadd.f32 %v354_v28, %v353_v26 }
 0x111   :  { %356 = vst [vmem:[%s619_s4] sm:$0x1] %v355_v29 }

// kernel: basic_block_forward.8
= control target key start
LH: loop header
LB: loop body
LE: loop exit
PB: predicated region body
PF: predicated region fallthrough
CT: control target
= control target key end

     0   :  { %vm107_vm0 = vcmask 588800   ;;  %vm132_vm1 = vcmask 1043456   ;;  %s651_s1 = inlined_call_operand.vmem [shape: bf16[72,128], index: 1, kind: input, shape index: {}]   ;;  %s652_s0 = inlined_call_operand.vmem [shape: bf16[128,72], index: 0, kind: input, shape index: {}]   ;;  %s653_s2 = inlined_call_operand.vmem [shape: bf16[128,128], index: 2, kind: output, shape index: {0}]   ;;  %s654_s3 = inlined_call_operand.vmem [shape: f32[1,1,128], index: 3, kind: output, shape index: {1}]   ;;  %s655_s4 = inlined_call_operand.vmem [shape: f32[1,1,128], index: 4, kind: output, shape index: {2}]  }
   0x1   :  { %v536_v0 = vld [vmem:[%s651_s1] sm:$0xff]   ;;  %v537_v1 = vld [vmem:[%s651_s1 + $0x8] sm:$0xff]   ;;  %v538_v2 = vld [vmem:[%s651_s1 + $0x10] sm:$0xff]  }
   0x2   :  { %498 = vmatprep.subr.bf16.mxu0 %v536_v0  ;;  %524 = vmatprep.subr.bf16.mxu1 %v536_v0  ;;  %v541_v3 = vld [vmem:[%s652_s0] sm:$0xff]   ;;  %v539_v4 = vld [vmem:[%s651_s1 + $0x18] sm:$0xff]   ;;  %v542_v8 = vld [vmem:[%s652_s0 + $0x8] sm:$0xff]  }
   0x3   :  { %499 = vmatpush3.bf16.msra.mxu0 %v536_v0  ;;  %529 = vmatpush3.bf16.msra.mxu1 %v536_v0  ;;  %v545_v5 = vld [vmem:[%s652_s0 + $0x20] sm:$0xff]   ;;  %v546_v9 = vld [vmem:[%s652_s0 + $0x28] sm:$0xff]   ;;  %v543_v10 = vld [vmem:[%s652_s0 + $0x10] sm:$0xff]  }
   0x4   :  { %500 = vmatprep.subr.bf16.mxu0 %v537_v1  ;;  %525 = vmatprep.subr.bf16.mxu1 %v537_v1  ;;  %v540_v6 = vld [vmem:[%s651_s1 + $0x20] ss:$0 sps:$4 sm:$0xff]   ;;  %v547_v11 = vld [vmem:[%s652_s0 + $0x30] sm:$0xff]   ;;  %v544_v12 = vld [vmem:[%s652_s0 + $0x18] sm:$0xff]  }
   0x5   :  { %508 = vmatprep.mubr.msk.bf16.mxu0 %vm107_vm0, %v541_v3  ;;  %516 = vmatprep.mubr.msk.bf16.mxu1 %vm107_vm0, %v545_v5  ;;  %v134_v7 = vsel %vm132_vm1, %v540_v6, 0  ;;  %v548_v13 = vld [vmem:[%s652_s0 + $0x38] sm:$0xff]  }
   0x7   :  { %501 = vmatpush3.bf16.msra.mxu0 %v537_v1  ;;  %530 = vmatpush3.bf16.msra.mxu1 %v537_v1 }
   0x8   :  { %502 = vmatprep.subr.bf16.mxu0 %v538_v2  ;;  %526 = vmatprep.subr.bf16.mxu1 %v538_v2 }
   0xb   :  { %503 = vmatpush3.bf16.msra.mxu0 %v538_v2  ;;  %531 = vmatpush3.bf16.msra.mxu1 %v538_v2 }
   0xc   :  { %504 = vmatprep.subr.bf16.mxu0 %v539_v4  ;;  %527 = vmatprep.subr.bf16.mxu1 %v539_v4 }
   0xf   :  { %505 = vmatpush3.bf16.msra.mxu0 %v539_v4  ;;  %532 = vmatpush3.bf16.msra.mxu1 %v539_v4 }
  0x10   :  { %534 = vmatprep.subr.msk.bf16.mxu0 %vm132_vm1, %v540_v6  ;;  %535 = vmatprep.subr.msk.bf16.mxu1 %vm132_vm1, %v540_v6 }
  0x13   :  { %507 = vmatpush3.bf16.msra.mxu0 %v134_v7  ;;  %533 = vmatpush3.bf16.msra.mxu1 %v134_v7 }
  0x16   :  { %509 = vmatmul.mubr.msk.bf16.vlgmr.msra.gmra.mrb[0].mxu0 %vm107_vm0, %v542_v8  ;;  %517 = vmatmul.mubr.msk.bf16.vlgmr.msra.gmra.mrb[0].mxu1 %vm107_vm0, %v546_v9 }
  0x17   :  { %512 = vmatprep.mubr.msk.bf16.mxu0 %vm107_vm0, %v543_v10  ;;  %520 = vmatprep.mubr.msk.bf16.mxu1 %vm107_vm0, %v547_v11 }
  0x1e   :  { %513 = vmatmul.mubr.msk.bf16.gmra.mrb[4].mxu0 %vm107_vm0, %v544_v12  ;;  %521 = vmatmul.mubr.msk.bf16.gmra.mrb[4].mxu1 %vm107_vm0, %v548_v13 }
  0xe9   :  { %v510_v14 = vpop.f32.mrb[0].mxu0  ;;  %v518_v15 = vpop.f32.mrb[0].mxu1 }
  0xea   :  { %v170_v16 = vpop.f32.mrb[1].mxu0  ;;  %v202_v17 = vpop.f32.mrb[1].mxu1  ;;  %v337_v29 = vmul.f32 %v510_v14, %v510_v14  ;;  %v345_v1 = vmul.f32 %v518_v15, %v518_v15 }
  0xeb   :  { %v511_v18 = vpop.f32.mrb[2].mxu0  ;;  %v519_v19 = vpop.f32.mrb[2].mxu1  ;;  %v335_v20 = vmul.f32 %v170_v16, %v170_v16  ;;  %v343_v59 = vmul.f32 %v202_v17, %v202_v17 }
  0xec   :  { %v446_v21 = vpack.c.bf16 %v511_v18, %v510_v14  ;;  %v173_v22 = vpop.f32.mrb[3].mxu0  ;;  %v466_v23 = vpack.c.bf16 %v519_v19, %v518_v15  ;;  %v205_v24 = vpop.f32.mrb[3].mxu1  ;;  %v338_v32 = vmul.f32 %v511_v18, %v511_v18  ;;  %v346_v4 = vmul.f32 %v519_v19, %v519_v19 }
  0xed   :  { %v441_v25 = vpack.c.bf16 %v173_v22, %v170_v16  ;;  %v313_v26 = vadd.f32 %v173_v22, %v170_v16  ;;  %v336_v27 = vmul.f32 %v173_v22, %v173_v22  ;;  %v461_v28 = vpack.c.bf16 %v205_v24, %v202_v17 }
  0xee   :  { %478 = vst [vmem:[%s653_s2 + $0x8] sm:$0xff] %v446_v21   ;;  %482 = vst [vmem:[%s653_s2 + $0x28] sm:$0xff] %v466_v23   ;;  %v344_v0 = vmul.f32 %v205_v24, %v205_v24 }
  0xef   :  { %442 = vst [vmem:[%s653_s2] sm:$0xff] %v441_v25   ;;  %v314_v30 = vadd.f32 %v510_v14, %v313_v26  ;;  %v351_v31 = vadd.f32 %v336_v27, %v335_v20  ;;  %481 = vst [vmem:[%s653_s2 + $0x20] sm:$0xff] %v461_v28  }
  0xf1   :  { %v352_v33 = vadd.f32 %v351_v31, %v337_v29  ;;  %v514_v34 = vpop.f32.mrb[4].mxu0  ;;  %v315_v35 = vadd.f32 %v511_v18, %v314_v30  ;;  %v522_v36 = vpop.f32.mrb[4].mxu1 }
  0xf2   :  { %v186_v37 = vpop.f32.mrb[5].mxu0  ;;  %v218_v38 = vpop.f32.mrb[5].mxu1  ;;  %v341_v53 = vmul.f32 %v514_v34, %v514_v34  ;;  %v349_v13 = vmul.f32 %v522_v36, %v522_v36 }
  0xf3   :  { %v316_v39 = vadd.f32 %v315_v35, %v186_v37  ;;  %v339_v40 = vmul.f32 %v186_v37, %v186_v37  ;;  %v353_v41 = vadd.f32 %v352_v33, %v338_v32  ;;  %v515_v42 = vpop.f32.mrb[6].mxu0  ;;  %v523_v43 = vpop.f32.mrb[6].mxu1  ;;  %v347_v7 = vmul.f32 %v218_v38, %v218_v38 }
  0xf4   :  { %v456_v44 = vpack.c.bf16 %v515_v42, %v514_v34  ;;  %v189_v45 = vpop.f32.mrb[7].mxu0  ;;  %v476_v46 = vpack.c.bf16 %v523_v43, %v522_v36  ;;  %v221_v47 = vpop.f32.mrb[7].mxu1  ;;  %v342_v56 = vmul.f32 %v515_v42, %v515_v42 }
  0xf5   :  { %v354_v48 = vadd.f32 %v353_v41, %v339_v40  ;;  %v451_v49 = vpack.c.bf16 %v189_v45, %v186_v37  ;;  %v317_v50 = vadd.f32 %v316_v39, %v189_v45  ;;  %v340_v51 = vmul.f32 %v189_v45, %v189_v45 }
  0xf6   :  { %480 = vst [vmem:[%s653_s2 + $0x18] sm:$0xff] %v456_v44   ;;  %484 = vst [vmem:[%s653_s2 + $0x38] sm:$0xff] %v476_v46   ;;  %v471_v52 = vpack.c.bf16 %v221_v47, %v218_v38  ;;  %v348_v12 = vmul.f32 %v221_v47, %v221_v47 }
  0xf7   :  { %479 = vst [vmem:[%s653_s2 + $0x10] sm:$0xff] %v451_v49   ;;  %v318_v54 = vadd.f32 %v514_v34, %v317_v50  ;;  %v355_v55 = vadd.f32 %v354_v48, %v340_v51 }
  0xf8   :  { %483 = vst [vmem:[%s653_s2 + $0x30] sm:$0xff] %v471_v52  }
  0xf9   :  { %v356_v57 = vadd.f32 %v355_v55, %v341_v53  ;;  %v319_v58 = vadd.f32 %v515_v42, %v318_v54 }
  0xfb   :  { %v320_v60 = vadd.f32 %v319_v58, %v202_v17  ;;  %v357_v61 = vadd.f32 %v356_v57, %v342_v56  ;;  %v350_v17 = vmul.f32 %v523_v43, %v523_v43 }
  0xfd   :  { %v358_v62 = vadd.f32 %v357_v61, %v343_v59  ;;  %v321_v63 = vadd.f32 %v320_v60, %v205_v24 }
  0xff   :  { %v322_v2 = vadd.f32 %v518_v15, %v321_v63  ;;  %v359_v3 = vadd.f32 %v358_v62, %v344_v0 }
 0x101   :  { %v360_v5 = vadd.f32 %v359_v3, %v345_v1  ;;  %v323_v6 = vadd.f32 %v519_v19, %v322_v2 }
 0x103   :  { %v324_v8 = vadd.f32 %v323_v6, %v218_v38  ;;  %v361_v9 = vadd.f32 %v360_v5, %v346_v4 }
 0x105   :  { %v362_v10 = vadd.f32 %v361_v9, %v347_v7  ;;  %v325_v11 = vadd.f32 %v324_v8, %v221_v47 }
 0x107   :  { %v326_v14 = vadd.f32 %v522_v36, %v325_v11  ;;  %v363_v16 = vadd.f32 %v362_v10, %v348_v12 }
 0x109   :  { %v327_v18 = vadd.f32 %v523_v43, %v326_v14  ;;  %v364_v20 = vadd.f32 %v363_v16, %v349_v13 }
 0x10b   :  { %v328_v21 = vrot.slane %v327_v18, 4  ;;  %v365_v22 = vadd.f32 %v364_v20, %v350_v17 }
 0x10d   :  { %v329_v23 = vadd.f32 %v328_v21, %v327_v18  ;;  %v366_v15 = vrot.slane %v365_v22, 4 }
 0x10f   :  { %v330_v24 = vrot.slane %v329_v23, 2  ;;  %v367_v25 = vadd.f32 %v366_v15, %v365_v22 }
 0x111   :  { %v331_v26 = vadd.f32 %v330_v24, %v329_v23  ;;  %v368_v19 = vrot.slane %v367_v25, 2 }
 0x113   :  { %v332_v27 = vrot.slane %v331_v26, 1  ;;  %v369_v28 = vadd.f32 %v368_v19, %v367_v25 }
 0x115   :  { %v333_v29 = vadd.f32 %v332_v27, %v331_v26  ;;  %v370_v30 = vrot.slane %v369_v28, 1 }
 0x117   :  { %334 = vst [vmem:[%s654_s3] sm:$0x1] %v333_v29  ;;  %v371_v31 = vadd.f32 %v370_v30, %v369_v28 }
 0x119   :  { %372 = vst [vmem:[%s655_s4] sm:$0x1] %v371_v31 }

// kernel: basic_block_forward.9
= control target key start
LH: loop header
LB: loop body
LE: loop exit
PB: predicated region body
PF: predicated region fallthrough
CT: control target
= control target key end

     0   :  { %s528_s0 = inlined_call_operand.vmem [shape: bf16[128,128], index: 0, kind: input, shape index: {}]   ;;  %s529_s1 = inlined_call_operand.vmem [shape: f32[1,128], index: 1, kind: input, shape index: {}]   ;;  %s530_s2 = inlined_call_operand.vmem [shape: f32[1,128], index: 2, kind: input, shape index: {}]   ;;  %s531_s3 = inlined_call_operand.vmem [shape: bf16[128,128], index: 3, kind: input, shape index: {}]   ;;  %s532_s4 = inlined_call_operand.vmem [shape: f32[1,128], index: 4, kind: input, shape index: {}]   ;;  %s533_s5 = inlined_call_operand.vmem [shape: f32[1,128], index: 5, kind: input, shape index: {}]   ;;  %s534_s6 = inlined_call_operand.vmem [shape: f32[128,128], index: 6, kind: output, shape index: {}]  }
   0x1   :  { %v236_v0 = vld [vmem:[%s528_s0] sm:$0xff]   ;;  %v299_v9 = vld [vmem:[%s528_s0 + $0x8] sm:$0xff]   ;;  %v300_v15 = vld [vmem:[%s528_s0 + $0x10] sm:$0xff]  }
   0x2   :  { %v354_v1 = vld [vmem:[%s529_s1] ss:$0 sm:$0xff]  ;;  %v237_v2 = vunpack.c.l.bf16 %v236_v0  ;;  %v238_v5 = vunpack.c.h.bf16 %v236_v0  ;;  %v306_v10 = vld [vmem:[%s531_s3 + $0x8] sm:$0xff]   ;;  %v241_v13 = vunpack.c.l.bf16 %v299_v9  ;;  %v307_v16 = vld [vmem:[%s531_s3 + $0x10] sm:$0xff]   ;;  %v242_v19 = vunpack.c.h.bf16 %v299_v9 }
   0x3   :  { %v268_v3 = vld [vmem:[%s531_s3] sm:$0xff]   ;;  %v273_v14 = vunpack.c.l.bf16 %v306_v10  ;;  %v274_v20 = vunpack.c.h.bf16 %v306_v10  ;;  %v245_v28 = vunpack.c.l.bf16 %v300_v15  ;;  %v277_v29 = vunpack.c.l.bf16 %v307_v16  ;;  %v301_v34 = vld [vmem:[%s528_s0 + $0x18] sm:$0xff]   ;;  %v303_v9 = vld [vmem:[%s528_s0 + $0x28] sm:$0xff]  }
   0x4   :  { %v362_v4 = vld [vmem:[%s532_s4] ss:$0 sm:$0xff]  ;;  %v269_v7 = vunpack.c.l.bf16 %v268_v3  ;;  %v270_v8 = vunpack.c.h.bf16 %v268_v3  ;;  %v62_v11 = vmul.f32 %v237_v2, %v354_v1  ;;  %v63_v12 = vmul.f32 %v238_v5, %v354_v1  ;;  %v308_v43 = vld [vmem:[%s531_s3 + $0x18] sm:$0xff]  }
   0x5   :  { %v367_v6 = vld [vmem:[%s530_s2] ss:$0 sm:$0xff]  ;;  %v64_v23 = vmul.f32 %v241_v13, %v354_v1  ;;  %v142_v24 = vmul.f32 %v273_v14, %v362_v4  ;;  %v65_v26 = vmul.f32 %v242_v19, %v354_v1  ;;  %v143_v27 = vmul.f32 %v274_v20, %v362_v4  ;;  %v310_v14 = vld [vmem:[%s531_s3 + $0x28] sm:$0xff]  }
   0x6   :  { %v140_v17 = vmul.f32 %v269_v7, %v362_v4  ;;  %v141_v18 = vmul.f32 %v270_v8, %v362_v4  ;;  %v85_v21 = vadd.f32 %v367_v6, %v62_v11  ;;  %v86_v22 = vadd.f32 %v367_v6, %v63_v12  ;;  %v392_v25 = vld [vmem:[%s533_s5] ss:$0 sm:$0xff] }
   0x7   :  { %v87_v32 = vadd.f32 %v367_v6, %v64_v23  ;;  %v246_v33 = vunpack.c.h.bf16 %v300_v15  ;;  %v88_v35 = vadd.f32 %v367_v6, %v65_v26  ;;  %v66_v36 = vmul.f32 %v245_v28, %v354_v1  ;;  %v302_v56 = vld [vmem:[%s528_s0 + $0x20] sm:$0xff]   ;;  %v304_v28 = vld [vmem:[%s528_s0 + $0x30] sm:$0xff]  }
   0x8   :  { %v156_v30 = vadd.f32 %v140_v17, %v85_v21  ;;  %v157_v31 = vadd.f32 %v141_v18, %v86_v22  ;;  %v144_v37 = vmul.f32 %v277_v29, %v362_v4  ;;  %v278_v38 = vunpack.c.h.bf16 %v307_v16  ;;  %v309_v61 = vld [vmem:[%s531_s3 + $0x20] sm:$0xff]  }
   0x9   :  { %v158_v41 = vadd.f32 %v142_v24, %v87_v32  ;;  %v67_v42 = vmul.f32 %v246_v33, %v354_v1  ;;  %v159_v44 = vadd.f32 %v143_v27, %v88_v35  ;;  %v89_v45 = vadd.f32 %v367_v6, %v66_v36  ;;  %v311_v33 = vld [vmem:[%s531_s3 + $0x30] sm:$0xff]  }
   0xa   :  { %v179_v39 = vadd.f32 %v392_v25, %v156_v30  ;;  %v180_v40 = vadd.f32 %v392_v25, %v157_v31  ;;  %v145_v46 = vmul.f32 %v278_v38, %v362_v4  ;;  %v249_v47 = vunpack.c.l.bf16 %v301_v34 }
   0xb   :  { %v181_v50 = vadd.f32 %v392_v25, %v158_v41  ;;  %v90_v51 = vadd.f32 %v367_v6, %v67_v42  ;;  %v182_v52 = vadd.f32 %v392_v25, %v159_v44  ;;  %v160_v53 = vadd.f32 %v144_v37, %v89_v45 }
   0xc   :  { %v195_v48 = vmax.f32 %v179_v39, 0.0  ;;  %v196_v49 = vmax.f32 %v180_v40, 0.0  ;;  %v68_v54 = vmul.f32 %v249_v47, %v354_v1  ;;  %v281_v55 = vunpack.c.l.bf16 %v308_v43 }
   0xd   :  { %v197_v57 = vmax.f32 %v181_v50, 0.0  ;;  %v161_v58 = vadd.f32 %v145_v46, %v90_v51  ;;  %v250_v59 = vunpack.c.h.bf16 %v301_v34  ;;  %v282_v60 = vunpack.c.h.bf16 %v308_v43  ;;  %v305_v50 = vld [vmem:[%s528_s0 + $0x38] sm:$0xff]  }
   0xe   :  { %211 = vst [vmem:[%s534_s6] sm:$0xff] %v195_v48  ;;  %212 = vst [vmem:[%s534_s6 + $0x8] sm:$0xff] %v196_v49  ;;  %v198_v62 = vmax.f32 %v182_v52, 0.0  ;;  %v183_v63 = vadd.f32 %v392_v25, %v160_v53  ;;  %v91_v0 = vadd.f32 %v367_v6, %v68_v54  ;;  %v146_v2 = vmul.f32 %v281_v55, %v362_v4  ;;  %v312_v51 = vld [vmem:[%s531_s3 + $0x38] sm:$0xff]  }
   0xf   :  { %213 = vst [vmem:[%s534_s6 + $0x10] sm:$0xff] %v197_v57  ;;  %v184_v3 = vadd.f32 %v392_v25, %v161_v58  ;;  %v69_v5 = vmul.f32 %v250_v59, %v354_v1  ;;  %v147_v7 = vmul.f32 %v282_v60, %v362_v4  ;;  %v253_v8 = vunpack.c.l.bf16 %v302_v56 }
  0x10   :  { %214 = vst [vmem:[%s534_s6 + $0x18] sm:$0xff] %v198_v62  ;;  %v199_v10 = vmax.f32 %v183_v63, 0.0  ;;  %v162_v11 = vadd.f32 %v146_v2, %v91_v0  ;;  %v285_v12 = vunpack.c.l.bf16 %v309_v61  ;;  %v254_v13 = vunpack.c.h.bf16 %v302_v56 }
  0x11   :  { %v200_v15 = vmax.f32 %v184_v3, 0.0  ;;  %v92_v16 = vadd.f32 %v367_v6, %v69_v5  ;;  %v70_v17 = vmul.f32 %v253_v8, %v354_v1  ;;  %v286_v18 = vunpack.c.h.bf16 %v309_v61 }
  0x12   :  { %215 = vst [vmem:[%s534_s6 + $0x20] sm:$0xff] %v199_v10  ;;  %v185_v19 = vadd.f32 %v392_v25, %v162_v11  ;;  %v148_v20 = vmul.f32 %v285_v12, %v362_v4  ;;  %v71_v21 = vmul.f32 %v254_v13, %v354_v1  ;;  %v257_v22 = vunpack.c.l.bf16 %v303_v9 }
  0x13   :  { %216 = vst [vmem:[%s534_s6 + $0x28] sm:$0xff] %v200_v15  ;;  %v163_v23 = vadd.f32 %v147_v7, %v92_v16  ;;  %v93_v24 = vadd.f32 %v367_v6, %v70_v17  ;;  %v149_v26 = vmul.f32 %v286_v18, %v362_v4  ;;  %v289_v27 = vunpack.c.l.bf16 %v310_v14 }
  0x14   :  { %v201_v29 = vmax.f32 %v185_v19, 0.0  ;;  %v94_v30 = vadd.f32 %v367_v6, %v71_v21  ;;  %v72_v31 = vmul.f32 %v257_v22, %v354_v1  ;;  %v258_v32 = vunpack.c.h.bf16 %v303_v9 }
  0x15   :  { %v186_v34 = vadd.f32 %v392_v25, %v163_v23  ;;  %v164_v35 = vadd.f32 %v148_v20, %v93_v24  ;;  %v150_v36 = vmul.f32 %v289_v27, %v362_v4  ;;  %v290_v37 = vunpack.c.h.bf16 %v310_v14 }
  0x16   :  { %217 = vst [vmem:[%s534_s6 + $0x30] sm:$0xff] %v201_v29  ;;  %v165_v38 = vadd.f32 %v149_v26, %v94_v30  ;;  %v95_v39 = vadd.f32 %v367_v6, %v72_v31  ;;  %v73_v40 = vmul.f32 %v258_v32, %v354_v1  ;;  %v261_v41 = vunpack.c.l.bf16 %v304_v28 }
  0x17   :  { %v202_v42 = vmax.f32 %v186_v34, 0.0  ;;  %v187_v43 = vadd.f32 %v392_v25, %v164_v35  ;;  %v151_v44 = vmul.f32 %v290_v37, %v362_v4  ;;  %v293_v45 = vunpack.c.l.bf16 %v311_v33 }
  0x18   :  { %v188_v46 = vadd.f32 %v392_v25, %v165_v38  ;;  %v166_v47 = vadd.f32 %v150_v36, %v95_v39  ;;  %v96_v48 = vadd.f32 %v367_v6, %v73_v40  ;;  %v74_v49 = vmul.f32 %v261_v41, %v354_v1 }
  0x19   :  { %218 = vst [vmem:[%s534_s6 + $0x38] sm:$0xff] %v202_v42  ;;  %v203_v52 = vmax.f32 %v187_v43, 0.0  ;;  %v152_v53 = vmul.f32 %v293_v45, %v362_v4  ;;  %v262_v54 = vunpack.c.h.bf16 %v304_v28  ;;  %v294_v55 = vunpack.c.h.bf16 %v311_v33 }
  0x1a   :  { %v204_v56 = vmax.f32 %v188_v46, 0.0  ;;  %v189_v57 = vadd.f32 %v392_v25, %v166_v47  ;;  %v167_v58 = vadd.f32 %v151_v44, %v96_v48  ;;  %v97_v59 = vadd.f32 %v367_v6, %v74_v49 }
  0x1b   :  { %219 = vst [vmem:[%s534_s6 + $0x40] sm:$0xff] %v203_v52  ;;  %v75_v60 = vmul.f32 %v262_v54, %v354_v1  ;;  %v153_v61 = vmul.f32 %v294_v55, %v362_v4  ;;  %v265_v62 = vunpack.c.l.bf16 %v305_v50  ;;  %v297_v63 = vunpack.c.l.bf16 %v312_v51 }
  0x1c   :  { %220 = vst [vmem:[%s534_s6 + $0x48] sm:$0xff] %v204_v56  ;;  %v205_v0 = vmax.f32 %v189_v57, 0.0  ;;  %v190_v2 = vadd.f32 %v392_v25, %v167_v58  ;;  %v168_v3 = vadd.f32 %v152_v53, %v97_v59  ;;  %v266_v5 = vunpack.c.h.bf16 %v305_v50 }
  0x1d   :  { %v98_v7 = vadd.f32 %v367_v6, %v75_v60  ;;  %v76_v8 = vmul.f32 %v265_v62, %v354_v1  ;;  %v154_v9 = vmul.f32 %v297_v63, %v362_v4  ;;  %v298_v10 = vunpack.c.h.bf16 %v312_v51 }
  0x1e   :  { %221 = vst [vmem:[%s534_s6 + $0x50] sm:$0xff] %v205_v0  ;;  %v206_v11 = vmax.f32 %v190_v2, 0.0  ;;  %v191_v12 = vadd.f32 %v392_v25, %v168_v3  ;;  %v77_v13 = vmul.f32 %v266_v5, %v354_v1 }
  0x1f   :  { %v169_v14 = vadd.f32 %v153_v61, %v98_v7  ;;  %v99_v15 = vadd.f32 %v367_v6, %v76_v8  ;;  %v155_v16 = vmul.f32 %v298_v10, %v362_v4 }
  0x20   :  { %222 = vst [vmem:[%s534_s6 + $0x58] sm:$0xff] %v206_v11  ;;  %v207_v17 = vmax.f32 %v191_v12, 0.0  ;;  %v100_v18 = vadd.f32 %v367_v6, %v77_v13 }
  0x21   :  { %v192_v19 = vadd.f32 %v392_v25, %v169_v14  ;;  %v170_v20 = vadd.f32 %v154_v9, %v99_v15 }
  0x22   :  { %223 = vst [vmem:[%s534_s6 + $0x60] sm:$0xff] %v207_v17  ;;  %v171_v1 = vadd.f32 %v155_v16, %v100_v18 }
  0x23   :  { %v208_v21 = vmax.f32 %v192_v19, 0.0  ;;  %v193_v22 = vadd.f32 %v392_v25, %v170_v20 }
  0x24   :  { %v194_v4 = vadd.f32 %v392_v25, %v171_v1 }
  0x25   :  { %224 = vst [vmem:[%s534_s6 + $0x68] sm:$0xff] %v208_v21  ;;  %v209_v23 = vmax.f32 %v193_v22, 0.0 }
  0x26   :  { %v210_v24 = vmax.f32 %v194_v4, 0.0 }
  0x27   :  { %225 = vst [vmem:[%s534_s6 + $0x70] sm:$0xff] %v209_v23 }
  0x28   :  { %226 = vst [vmem:[%s534_s6 + $0x78] sm:$0xff] %v210_v24 }

// kernel: basic_block_forward.7
= control target key start
LH: loop header
LB: loop body
LE: loop exit
PB: predicated region body
PF: predicated region fallthrough
CT: control target
= control target key end

     0   :  { %vm97_vm0 = vcmask 1041408   ;;  %vm72_vm1 = vcmask 31744   ;;  %s574_s1 = inlined_call_operand.vmem [shape: bf16[4,128], index: 1, kind: input, shape index: {}]   ;;  %s575_s0 = inlined_call_operand.vmem [shape: bf16[128,4], index: 0, kind: input, shape index: {}]   ;;  %s576_s2 = inlined_call_operand.vmem [shape: bf16[128,128], index: 2, kind: output, shape index: {0}]   ;;  %s577_s3 = inlined_call_operand.vmem [shape: f32[1,1,128], index: 3, kind: output, shape index: {1}]   ;;  %s578_s4 = inlined_call_operand.vmem [shape: f32[1,1,128], index: 4, kind: output, shape index: {2}]  }
   0x1   :  { %v31_v0 = vld [vmem:[%s574_s1] sm:$0x3]  ;;  %v477_v3 = vld [vmem:[%s575_s0 + $0x8] sm:$0xff]   ;;  %v478_v4 = vld [vmem:[%s575_s0 + $0x10] sm:$0xff]  }
   0x2   :  { %474 = vmatprep.subr.msk.bf16.mxu0 %vm97_vm0, %v31_v0  ;;  %v99_v1 = vsel %vm97_vm0, %v31_v0, 0  ;;  %v476_v2 = vld [vmem:[%s575_s0] sm:$0xff]   ;;  %475 = vmatprep.subr.msk.bf16.mxu1 %vm97_vm0, %v31_v0  ;;  %v481_v6 = vld [vmem:[%s575_s0 + $0x28] sm:$0xff]   ;;  %v482_v7 = vld [vmem:[%s575_s0 + $0x30] sm:$0xff]  }
   0x3   :  { %455 = vmatpush3.bf16.msra.mxu0 %v99_v1  ;;  %473 = vmatpush3.bf16.msra.mxu1 %v99_v1  ;;  %v480_v5 = vld [vmem:[%s575_s0 + $0x20] sm:$0xff]   ;;  %v479_v8 = vld [vmem:[%s575_s0 + $0x18] sm:$0xff]  }
   0x4   :  { %456 = vmatprep.mubr.msk.bf16.mxu0 %vm72_vm1, %v476_v2  ;;  %464 = vmatprep.mubr.msk.bf16.mxu1 %vm72_vm1, %v480_v5  ;;  %v483_v9 = vld [vmem:[%s575_s0 + $0x38] sm:$0xff]  }
   0x6   :  { %457 = vmatmul.mubr.msk.bf16.vlgmr.msra.gmra.mrb[0].mxu0 %vm72_vm1, %v477_v3  ;;  %465 = vmatmul.mubr.msk.bf16.vlgmr.msra.gmra.mrb[0].mxu1 %vm72_vm1, %v481_v6 }
   0x7   :  { %460 = vmatprep.mubr.msk.bf16.mxu0 %vm72_vm1, %v478_v4  ;;  %468 = vmatprep.mubr.msk.bf16.mxu1 %vm72_vm1, %v482_v7 }
   0xe   :  { %461 = vmatmul.mubr.msk.bf16.gmra.mrb[4].mxu0 %vm72_vm1, %v479_v8  ;;  %469 = vmatmul.mubr.msk.bf16.gmra.mrb[4].mxu1 %vm72_vm1, %v483_v9 }
  0xd9   :  { %v458_v10 = vpop.f32.mrb[0].mxu0  ;;  %v466_v15 = vpop.f32.mrb[0].mxu1 }
  0xda   :  { %v135_v11 = vpop.f32.mrb[1].mxu0  ;;  %v167_v20 = vpop.f32.mrb[1].mxu1  ;;  %v302_v22 = vmul.f32 %v458_v10, %v458_v10  ;;  %v310_v61 = vmul.f32 %v466_v15, %v466_v15 }
  0xdb   :  { %v459_v12 = vpop.f32.mrb[2].mxu0  ;;  %v300_v16 = vmul.f32 %v135_v11, %v135_v11  ;;  %v467_v21 = vpop.f32.mrb[2].mxu1  ;;  %v308_v55 = vmul.f32 %v167_v20, %v167_v20 }
  0xdc   :  { %v406_v13 = vpack.c.bf16 %v459_v12, %v458_v10  ;;  %v138_v14 = vpop.f32.mrb[3].mxu0  ;;  %v426_v25 = vpack.c.bf16 %v467_v21, %v466_v15  ;;  %v170_v26 = vpop.f32.mrb[3].mxu1  ;;  %v303_v28 = vmul.f32 %v459_v12, %v459_v12  ;;  %v311_v0 = vmul.f32 %v467_v21, %v467_v21 }
  0xdd   :  { %v401_v17 = vpack.c.bf16 %v138_v14, %v135_v11  ;;  %v278_v18 = vadd.f32 %v138_v14, %v135_v11  ;;  %v301_v19 = vmul.f32 %v138_v14, %v138_v14  ;;  %v421_v27 = vpack.c.bf16 %v170_v26, %v167_v20 }
  0xde   :  { %438 = vst [vmem:[%s576_s2 + $0x8] sm:$0xff] %v406_v13   ;;  %442 = vst [vmem:[%s576_s2 + $0x28] sm:$0xff] %v426_v25   ;;  %v309_v60 = vmul.f32 %v170_v26, %v170_v26 }
  0xdf   :  { %402 = vst [vmem:[%s576_s2] sm:$0xff] %v401_v17   ;;  %v279_v23 = vadd.f32 %v458_v10, %v278_v18  ;;  %v316_v24 = vadd.f32 %v301_v19, %v300_v16  ;;  %441 = vst [vmem:[%s576_s2 + $0x20] sm:$0xff] %v421_v27  }
  0xe1   :  { %v317_v29 = vadd.f32 %v316_v24, %v302_v22  ;;  %v462_v30 = vpop.f32.mrb[4].mxu0  ;;  %v280_v31 = vadd.f32 %v459_v12, %v279_v23  ;;  %v470_v39 = vpop.f32.mrb[4].mxu1 }
  0xe2   :  { %v151_v32 = vpop.f32.mrb[5].mxu0  ;;  %v183_v44 = vpop.f32.mrb[5].mxu1  ;;  %v306_v46 = vmul.f32 %v462_v30, %v462_v30  ;;  %v314_v9 = vmul.f32 %v470_v39, %v470_v39 }
  0xe3   :  { %v281_v33 = vadd.f32 %v280_v31, %v151_v32  ;;  %v304_v34 = vmul.f32 %v151_v32, %v151_v32  ;;  %v318_v35 = vadd.f32 %v317_v29, %v303_v28  ;;  %v463_v36 = vpop.f32.mrb[6].mxu0  ;;  %v471_v45 = vpop.f32.mrb[6].mxu1  ;;  %v312_v3 = vmul.f32 %v183_v44, %v183_v44 }
  0xe4   :  { %v416_v37 = vpack.c.bf16 %v463_v36, %v462_v30  ;;  %v154_v38 = vpop.f32.mrb[7].mxu0  ;;  %v436_v49 = vpack.c.bf16 %v471_v45, %v470_v39  ;;  %v186_v50 = vpop.f32.mrb[7].mxu1  ;;  %v307_v52 = vmul.f32 %v463_v36, %v463_v36  ;;  %v315_v12 = vmul.f32 %v471_v45, %v471_v45 }
  0xe5   :  { %v319_v40 = vadd.f32 %v318_v35, %v304_v34  ;;  %v411_v41 = vpack.c.bf16 %v154_v38, %v151_v32  ;;  %v282_v42 = vadd.f32 %v281_v33, %v154_v38  ;;  %v305_v43 = vmul.f32 %v154_v38, %v154_v38 }
  0xe6   :  { %440 = vst [vmem:[%s576_s2 + $0x18] sm:$0xff] %v416_v37   ;;  %v431_v51 = vpack.c.bf16 %v186_v50, %v183_v44  ;;  %444 = vst [vmem:[%s576_s2 + $0x38] sm:$0xff] %v436_v49   ;;  %v313_v8 = vmul.f32 %v186_v50, %v186_v50 }
  0xe7   :  { %439 = vst [vmem:[%s576_s2 + $0x10] sm:$0xff] %v411_v41   ;;  %v283_v47 = vadd.f32 %v462_v30, %v282_v42  ;;  %v320_v48 = vadd.f32 %v319_v40, %v305_v43 }
  0xe8   :  { %443 = vst [vmem:[%s576_s2 + $0x30] sm:$0xff] %v431_v51  }
  0xe9   :  { %v321_v53 = vadd.f32 %v320_v48, %v306_v46  ;;  %v284_v54 = vadd.f32 %v463_v36, %v283_v47 }
  0xeb   :  { %v285_v56 = vadd.f32 %v284_v54, %v167_v20  ;;  %v322_v57 = vadd.f32 %v321_v53, %v307_v52 }
  0xed   :  { %v323_v58 = vadd.f32 %v322_v57, %v308_v55  ;;  %v286_v59 = vadd.f32 %v285_v56, %v170_v26 }
  0xef   :  { %v287_v62 = vadd.f32 %v466_v15, %v286_v59  ;;  %v324_v63 = vadd.f32 %v323_v58, %v309_v60 }
  0xf1   :  { %v325_v1 = vadd.f32 %v324_v63, %v310_v61  ;;  %v288_v2 = vadd.f32 %v467_v21, %v287_v62 }
  0xf3   :  { %v289_v4 = vadd.f32 %v288_v2, %v183_v44  ;;  %v326_v5 = vadd.f32 %v325_v1, %v311_v0 }
  0xf5   :  { %v327_v6 = vadd.f32 %v326_v5, %v312_v3  ;;  %v290_v7 = vadd.f32 %v289_v4, %v186_v50 }
  0xf7   :  { %v291_v10 = vadd.f32 %v470_v39, %v290_v7  ;;  %v328_v11 = vadd.f32 %v327_v6, %v313_v8 }
  0xf9   :  { %v292_v13 = vadd.f32 %v471_v45, %v291_v10  ;;  %v329_v14 = vadd.f32 %v328_v11, %v314_v9 }
  0xfb   :  { %v293_v16 = vrot.slane %v292_v13, 4  ;;  %v330_v17 = vadd.f32 %v329_v14, %v315_v12 }
  0xfd   :  { %v294_v18 = vadd.f32 %v293_v16, %v292_v13  ;;  %v331_v15 = vrot.slane %v330_v17, 4 }
  0xff   :  { %v295_v19 = vrot.slane %v294_v18, 2  ;;  %v332_v20 = vadd.f32 %v331_v15, %v330_v17 }
 0x101   :  { %v296_v22 = vadd.f32 %v295_v19, %v294_v18  ;;  %v333_v21 = vrot.slane %v332_v20, 2 }
 0x103   :  { %v297_v23 = vrot.slane %v296_v22, 1  ;;  %v334_v24 = vadd.f32 %v333_v21, %v332_v20 }
 0x105   :  { %v298_v25 = vadd.f32 %v297_v23, %v296_v22  ;;  %v335_v26 = vrot.slane %v334_v24, 1 }
 0x107   :  { %299 = vst [vmem:[%s577_s3] sm:$0x1] %v298_v25  ;;  %v336_v27 = vadd.f32 %v335_v26, %v334_v24 }
 0x109   :  { %337 = vst [vmem:[%s578_s4] sm:$0x1] %v336_v27 }

</bundles_post_ra>
